<compile_context>
chip_gen: v7x
topology: tpu7x:2x2x1
jax: 0.10.0
libtpu: 0.0.40
codegen_flags: <defaults>
</compile_context>

<pallas_src>
import functools

import jax
import jax.numpy as jnp
from jax.experimental import pallas as pl
from jax.experimental.pallas import tpu as pltpu


def _net_fused_kernel(x_ref, wbig_ref, bcb_ref, wf_ref, bf_ref, o_ref,
                      patches_ref, feat_ref, *,
                      B, BPAD, Cin, Cout, H, W, NPAD, KC, KCPAD):
    """Fused Conv3x3(pad=1)+bias+ReLU -> flatten -> Linear+bias.

    x_ref      : (B*Cin, LPAD)        H-padded, row-flattened input (data at lane 1..)
    wbig_ref   : (Cout*BPAD, KCPAD)   block-diag conv weight; col k*B*Cin + b*Cin + ci
                                      of row co*BPAD + b holds conv_w[co, ci, ky, kx]
    bcb_ref    : (Cout*BPAD, 1)       conv bias, repeated per batch row
    wf_ref     : (Cout*H*W, NPAD)     fc weight, zero-padded to 128 lanes
    bf_ref     : (1, NPAD)            fc bias, zero-padded
    o_ref      : (BPAD, NPAD)         logits tile (rows >= B / cols >= n_cls are junk/0)
    patches_ref: (KCPAD, H*W)         VMEM scratch, im2col patch matrix
    feat_ref   : (Cout*BPAD, H*W)     VMEM scratch, conv+ReLU features
    """
    HW = H * W
    nbc = B * Cin

    # Zero padded contraction rows (only if 9*B*Cin needed sublane padding).
    if KCPAD > KC:
        patches_ref[...] = jnp.zeros_like(patches_ref)

    # Edge-column masks for the horizontally shifted slices (kx = 0 / kx = 2).
    col = jax.lax.broadcasted_iota(jnp.int32, (1, HW), 1) % W
    mask_l = (col != 0).astype(jnp.float32)        # kills w == 0     (kx == 0)
    mask_r = (col != (W - 1)).astype(jnp.float32)  # kills w == W - 1 (kx == 2)

    # ---- im2col: 9 shifted lane-slices of the WHOLE (B*Cin, LPAD) block ----
    for ky in range(3):
        for kx in range(3):
            start = ky * W + kx                               # static shift
            patch = x_ref[:, start:start + HW]                # (B*Cin, HW)
            if kx == 0:
                patch = patch * mask_l
            elif kx == 2:
                patch = patch * mask_r
            k = ky * 3 + kx
            patches_ref[pl.ds(k * nbc, nbc), :] = patch

    # ---- backbone: conv as ONE MXU matmul, then bias + ReLU ----
    # feat row co*BPAD + b == feat[b, co, :]  (lane-dense H*W) so the
    # channel-major flatten needed by the classifier is free.
    feat = jnp.dot(wbig_ref[...], patches_ref[...],
                   preferred_element_type=jnp.float32)        # (Cout*BPAD, HW)
    feat_ref[...] = jnp.maximum(feat + bcb_ref[...], 0.0)

    # ---- classifier: Linear(Cout*H*W -> n_cls), lane/sublane-dense on the MXU ----
    acc = jnp.zeros((BPAD, NPAD), jnp.float32) + bf_ref[...]
    for c in range(Cout):
        a_blk = feat_ref[pl.ds(c * BPAD, BPAD), :]            # (BPAD, HW)
        w_blk = wf_ref[pl.ds(c * HW, HW), :]                  # (HW, NPAD)
        acc = acc + jnp.dot(a_blk, w_blk,
                            preferred_element_type=jnp.float32)
    o_ref[...] = acc


def net_forward(x, params):
    """Net.forward: backbone(x) -> flatten(start_dim=1) -> classifier."""
    B, Cin, H, W = x.shape
    conv_w = params["conv_w"]
    conv_b = params["conv_b"]
    fc_w = params["fc_w"]
    fc_b = params["fc_b"]
    Cout = conv_w.shape[0]
    HW = H * W
    n_cls = fc_w.shape[1]
    assert conv_w.shape == (Cout, Cin, 3, 3)
    assert fc_w.shape[0] == Cout * HW

    NPAD = ((n_cls + 127) // 128) * 128            # lane-dense classifier width
    BPAD = ((B + 7) // 8) * 8                      # sublane-dense batch rows
    LPAD = ((HW + 2 * W + 2 + 127) // 128) * 128   # lane-padded flat input rows
    KC = 9 * B * Cin                               # im2col contraction length
    KCPAD = ((KC + 7) // 8) * 8

    # --- tiny XLA-side layout prep (a few KB; no compute) ---
    # Pad H by 1, flatten (H+2, W) per (b, ci) row, shift right by 1 lane so the
    # (ky, kx) window slice starts at lane ky*W + kx, and lane-pad to LPAD.
    xh = jnp.pad(x.astype(jnp.float32), ((0, 0), (0, 0), (1, 1), (0, 0)))
    xf = xh.reshape(B * Cin, (H + 2) * W)
    x_in = jnp.pad(xf, ((0, 0), (1, LPAD - 1 - (H + 2) * W)))

    # Block-diagonal conv weight: row co*BPAD + b, col k*B*Cin + b*Cin + ci.
    wct = conv_w.reshape(Cout, Cin, 9).transpose(0, 2, 1).astype(jnp.float32)
    eye_b = jnp.eye(BPAD, B, dtype=jnp.float32)            # (BPAD, B)
    wbig = (wct[:, None, :, None, :] *
            eye_b[None, :, None, :, None]).reshape(Cout * BPAD, KC)
    if KCPAD > KC:
        wbig = jnp.pad(wbig, ((0, 0), (0, KCPAD - KC)))
    bcb = jnp.repeat(conv_b.astype(jnp.float32), BPAD).reshape(Cout * BPAD, 1)

    # TODO(synk): pre-pad the fc weight/bias once at init time; under jit this
    # per-call zero-pad is a small (~1 MiB) HBM write that could be hoisted.
    wf = jnp.zeros((Cout * HW, NPAD), jnp.float32).at[:, :n_cls].set(
        fc_w.astype(jnp.float32))
    bf = jnp.zeros((1, NPAD), jnp.float32).at[:, :n_cls].set(
        fc_b.reshape(1, n_cls).astype(jnp.float32))

    kernel = functools.partial(_net_fused_kernel, B=B, BPAD=BPAD, Cin=Cin,
                               Cout=Cout, H=H, W=W, NPAD=NPAD,
                               KC=KC, KCPAD=KCPAD)
    # TODO(synk): for large B, add a grid over batch tiles with
    # dimension_semantics=("parallel",) so v7x's two TensorCores split the work;
    # at B=2 the whole problem is one output tile and a grid only adds overhead.
    out = pl.pallas_call(
        kernel,
        out_shape=jax.ShapeDtypeStruct((BPAD, NPAD), jnp.float32),
        in_specs=[
            pl.BlockSpec((B * Cin, LPAD), lambda: (0, 0)),
            pl.BlockSpec((Cout * BPAD, KCPAD), lambda: (0, 0)),
            pl.BlockSpec((Cout * BPAD, 1), lambda: (0, 0)),
            pl.BlockSpec((Cout * HW, NPAD), lambda: (0, 0)),
            pl.BlockSpec((1, NPAD), lambda: (0, 0)),
        ],
        out_specs=pl.BlockSpec((BPAD, NPAD), lambda: (0, 0)),
        scratch_shapes=[
            pltpu.VMEM((KCPAD, HW), jnp.float32),
            pltpu.VMEM((Cout * BPAD, HW), jnp.float32),
        ],
    )(x_in, wbig, bcb, wf, bf)
    return out[:B, :n_cls]


def net_forward_reference(x, params):
    """Pure-JAX reference (correctness check only)."""
    feat = jax.lax.conv_general_dilated(
        x, params["conv_w"], window_strides=(1, 1), padding="SAME",
        dimension_numbers=("NCHW", "OIHW", "NCHW"),
        precision=jax.lax.Precision.HIGHEST)
    feat = jax.nn.relu(feat + params["conv_b"][None, :, None, None])
    flat = feat.reshape(x.shape[0], -1)
    return jnp.dot(flat, params["fc_w"],
                   precision=jax.lax.Precision.HIGHEST) + params["fc_b"]


def init_params(key, cin=4, cout=8, h=16, w=16, num_classes=10):
    k1, k2, k3, k4 = jax.random.split(key, 4)
    feat_dim = cout * h * w
    return {
        "conv_w": jax.random.normal(k1, (cout, cin, 3, 3), jnp.float32) * 0.1,
        "conv_b": jax.random.normal(k2, (cout,), jnp.float32) * 0.1,
        "fc_w": jax.random.normal(k3, (feat_dim, num_classes), jnp.float32) * 0.02,
        "fc_b": jax.random.normal(k4, (num_classes,), jnp.float32) * 0.02,
    }


if __name__ == "__main__":
    key = jax.random.PRNGKey(0)
    kx, kp = jax.random.split(key)
    B, Cin, H, W = 2, 4, 16, 16
    x = jax.random.normal(kx, (B, Cin, H, W), jnp.float32)
    params = init_params(kp, cin=Cin, cout=8, h=H, w=W, num_classes=10)

    out = jax.jit(net_forward)(x, params)
    out = jax.block_until_ready(out)
    assert out.shape == (B, 10), out.shape
    assert bool(jnp.all(jnp.isfinite(out)))

    ref = net_forward_reference(x, params)
    assert bool(jnp.allclose(out, ref, atol=2e-2, rtol=2e-2)), (
        float(jnp.max(jnp.abs(out - ref))))

    print("KERNEL_OK")
</pallas_src>

<mosaic_0001>
module attributes {stable_mosaic.version = 11 : i64} {
  func.func @_net_fused_kernel(%arg0: memref<8x384xf32, #tpu.memory_space<vmem>>, %arg1: memref<64x72xf32, #tpu.memory_space<vmem>>, %arg2: memref<64x1xf32, #tpu.memory_space<vmem>>, %arg3: memref<2048x128xf32, #tpu.memory_space<vmem>>, %arg4: memref<1x128xf32, #tpu.memory_space<vmem>>, %arg5: memref<8x128xf32, #tpu.memory_space<vmem>>, %arg6: memref<72x256xf32, #tpu.memory_space<vmem>>, %arg7: memref<64x256xf32, #tpu.memory_space<vmem>>) attributes {dimension_semantics = [], scalar_prefetch = 0 : i64, scratch_operands = 2 : i64, tpu.core_type = #tpu.core_type<tc>} {
    %0 = tpu.iota {dimensions = array<i32: 1>} : vector<1x256xi32>
    %c16_i32 = arith.constant 16 : i32
    %c0_i32 = arith.constant 0 : i32
    %1 = arith.cmpi eq, %c16_i32, %c0_i32 : i32
    %c1_i32 = arith.constant 1 : i32
    %2 = arith.select %1, %c1_i32, %c16_i32 : i32
    %3 = vector.broadcast %2 : i32 to vector<1x256xi32>
    %4 = arith.remsi %0, %3 : vector<1x256xi32>
    %c0_i32_0 = arith.constant 0 : i32
    %5 = vector.broadcast %c0_i32_0 : i32 to vector<1x256xi32>
    %6 = arith.cmpi ne, %4, %5 : vector<1x256xi32>
    %c0_i32_1 = arith.constant 0 : i32
    %7 = vector.broadcast %c0_i32_1 : i32 to vector<1x256xi32>
    %8 = arith.cmpi slt, %4, %7 : vector<1x256xi32>
    %c0_i32_2 = arith.constant 0 : i32
    %9 = arith.cmpi slt, %2, %c0_i32_2 : i32
    %10 = vector.broadcast %9 : i1 to vector<1x256xi1>
    %11 = vector.broadcast %10 : vector<1x256xi1> to vector<1x256xi1>
    %12 = arith.xori %8, %11 : vector<1x256xi1>
    %13 = arith.andi %12, %6 : vector<1x256xi1>
    %14 = vector.broadcast %2 : i32 to vector<1x256xi32>
    %15 = arith.addi %4, %14 : vector<1x256xi32>
    %16 = arith.select %13, %15, %4 : vector<1x256xi1>, vector<1x256xi32>
    %c0_i32_3 = arith.constant 0 : i32
    %17 = vector.broadcast %c0_i32_3 : i32 to vector<1x256xi32>
    %18 = arith.cmpi ne, %16, %17 : vector<1x256xi32>
    %19 = arith.extui %18 : vector<1x256xi1> to vector<1x256xi32>
    %20 = arith.sitofp %19 : vector<1x256xi32> to vector<1x256xf32>
    %c15_i32 = arith.constant 15 : i32
    %21 = vector.broadcast %c15_i32 : i32 to vector<1x256xi32>
    %22 = arith.cmpi ne, %16, %21 : vector<1x256xi32>
    %23 = arith.extui %22 : vector<1x256xi1> to vector<1x256xi32>
    %24 = arith.sitofp %23 : vector<1x256xi32> to vector<1x256xf32>
    %c0 = arith.constant 0 : index
    %c0_4 = arith.constant 0 : index
    %25 = vector.load %arg0[%c0, %c0_4] : memref<8x384xf32, #tpu.memory_space<vmem>>, vector<8x256xf32>
    %26 = vector.broadcast %20 : vector<1x256xf32> to vector<8x256xf32>
    %27 = arith.mulf %25, %26 : vector<8x256xf32>
    %c0_5 = arith.constant 0 : index
    %c0_6 = arith.constant 0 : index
    %28 = vector.load %arg6[%c0_5, %c0_6] : memref<72x256xf32, #tpu.memory_space<vmem>>, vector<8x256xf32>
    tpu.vector_store %arg6[%c0_5, %c0_6], %27 {strides = array<i32>} : memref<72x256xf32, #tpu.memory_space<vmem>>, vector<8x256xf32>,
    %c0_7 = arith.constant 0 : index
    %c1 = arith.constant 1 : index
    %29 = vector.load %arg0[%c0_7, %c1] : memref<8x384xf32, #tpu.memory_space<vmem>>, vector<8x256xf32>
    %c8 = arith.constant 8 : index
    %c0_8 = arith.constant 0 : index
    %30 = vector.load %arg6[%c8, %c0_8] : memref<72x256xf32, #tpu.memory_space<vmem>>, vector<8x256xf32>
    tpu.vector_store %arg6[%c8, %c0_8], %29 {strides = array<i32>} : memref<72x256xf32, #tpu.memory_space<vmem>>, vector<8x256xf32>,
    %c0_9 = arith.constant 0 : index
    %c2 = arith.constant 2 : index
    %31 = vector.load %arg0[%c0_9, %c2] : memref<8x384xf32, #tpu.memory_space<vmem>>, vector<8x256xf32>
    %32 = vector.broadcast %24 : vector<1x256xf32> to vector<8x256xf32>
    %33 = arith.mulf %31, %32 : vector<8x256xf32>
    %c16 = arith.constant 16 : index
    %c0_10 = arith.constant 0 : index
    %34 = vector.load %arg6[%c16, %c0_10] : memref<72x256xf32, #tpu.memory_space<vmem>>, vector<8x256xf32>
    tpu.vector_store %arg6[%c16, %c0_10], %33 {strides = array<i32>} : memref<72x256xf32, #tpu.memory_space<vmem>>, vector<8x256xf32>,
    %c0_11 = arith.constant 0 : index
    %c16_12 = arith.constant 16 : index
    %35 = vector.load %arg0[%c0_11, %c16_12] : memref<8x384xf32, #tpu.memory_space<vmem>>, vector<8x256xf32>
    %36 = vector.broadcast %20 : vector<1x256xf32> to vector<8x256xf32>
    %37 = arith.mulf %35, %36 : vector<8x256xf32>
    %c24 = arith.constant 24 : index
    %c0_13 = arith.constant 0 : index
    %38 = vector.load %arg6[%c24, %c0_13] : memref<72x256xf32, #tpu.memory_space<vmem>>, vector<8x256xf32>
    tpu.vector_store %arg6[%c24, %c0_13], %37 {strides = array<i32>} : memref<72x256xf32, #tpu.memory_space<vmem>>, vector<8x256xf32>,
    %c0_14 = arith.constant 0 : index
    %c17 = arith.constant 17 : index
    %39 = vector.load %arg0[%c0_14, %c17] : memref<8x384xf32, #tpu.memory_space<vmem>>, vector<8x256xf32>
    %c32 = arith.constant 32 : index
    %c0_15 = arith.constant 0 : index
    %40 = vector.load %arg6[%c32, %c0_15] : memref<72x256xf32, #tpu.memory_space<vmem>>, vector<8x256xf32>
    tpu.vector_store %arg6[%c32, %c0_15], %39 {strides = array<i32>} : memref<72x256xf32, #tpu.memory_space<vmem>>, vector<8x256xf32>,
    %c0_16 = arith.constant 0 : index
    %c18 = arith.constant 18 : index
    %41 = vector.load %arg0[%c0_16, %c18] : memref<8x384xf32, #tpu.memory_space<vmem>>, vector<8x256xf32>
    %42 = vector.broadcast %24 : vector<1x256xf32> to vector<8x256xf32>
    %43 = arith.mulf %41, %42 : vector<8x256xf32>
    %c40 = arith.constant 40 : index
    %c0_17 = arith.constant 0 : index
    %44 = vector.load %arg6[%c40, %c0_17] : memref<72x256xf32, #tpu.memory_space<vmem>>, vector<8x256xf32>
    tpu.vector_store %arg6[%c40, %c0_17], %43 {strides = array<i32>} : memref<72x256xf32, #tpu.memory_space<vmem>>, vector<8x256xf32>,
    %c0_18 = arith.constant 0 : index
    %c32_19 = arith.constant 32 : index
    %45 = vector.load %arg0[%c0_18, %c32_19] : memref<8x384xf32, #tpu.memory_space<vmem>>, vector<8x256xf32>
    %46 = vector.broadcast %20 : vector<1x256xf32> to vector<8x256xf32>
    %47 = arith.mulf %45, %46 : vector<8x256xf32>
    %c48 = arith.constant 48 : index
    %c0_20 = arith.constant 0 : index
    %48 = vector.load %arg6[%c48, %c0_20] : memref<72x256xf32, #tpu.memory_space<vmem>>, vector<8x256xf32>
    tpu.vector_store %arg6[%c48, %c0_20], %47 {strides = array<i32>} : memref<72x256xf32, #tpu.memory_space<vmem>>, vector<8x256xf32>,
    %c0_21 = arith.constant 0 : index
    %c33 = arith.constant 33 : index
    %49 = vector.load %arg0[%c0_21, %c33] : memref<8x384xf32, #tpu.memory_space<vmem>>, vector<8x256xf32>
    %c56 = arith.constant 56 : index
    %c0_22 = arith.constant 0 : index
    %50 = vector.load %arg6[%c56, %c0_22] : memref<72x256xf32, #tpu.memory_space<vmem>>, vector<8x256xf32>
    tpu.vector_store %arg6[%c56, %c0_22], %49 {strides = array<i32>} : memref<72x256xf32, #tpu.memory_space<vmem>>, vector<8x256xf32>,
    %c0_23 = arith.constant 0 : index
    %c34 = arith.constant 34 : index
    %51 = vector.load %arg0[%c0_23, %c34] : memref<8x384xf32, #tpu.memory_space<vmem>>, vector<8x256xf32>
    %52 = vector.broadcast %24 : vector<1x256xf32> to vector<8x256xf32>
    %53 = arith.mulf %51, %52 : vector<8x256xf32>
    %c64 = arith.constant 64 : index
    %c0_24 = arith.constant 0 : index
    %54 = vector.load %arg6[%c64, %c0_24] : memref<72x256xf32, #tpu.memory_space<vmem>>, vector<8x256xf32>
    tpu.vector_store %arg6[%c64, %c0_24], %53 {strides = array<i32>} : memref<72x256xf32, #tpu.memory_space<vmem>>, vector<8x256xf32>,
    %c0_25 = arith.constant 0 : index
    %c0_26 = arith.constant 0 : index
    %55 = vector.load %arg1[%c0_25, %c0_26] : memref<64x72xf32, #tpu.memory_space<vmem>>, vector<64x72xf32>
    %c0_27 = arith.constant 0 : index
    %c0_28 = arith.constant 0 : index
    %56 = vector.load %arg6[%c0_27, %c0_28] : memref<72x256xf32, #tpu.memory_space<vmem>>, vector<72x256xf32>
    %cst = arith.constant dense<0.000000e+00> : vector<64x256xf32>
    %57 = tpu.matmul %55, %56, %cst {dimension_numbers = #tpu.dot_dimension_numbers<[1], [0], [0], [1], [0, 0, 1, 1], [], []>} : vector<64x72xf32>, vector<72x256xf32>, vector<64x256xf32> -> vector<64x256xf32>
    %c0_29 = arith.constant 0 : index
    %c0_30 = arith.constant 0 : index
    %58 = vector.load %arg2[%c0_29, %c0_30] : memref<64x1xf32, #tpu.memory_space<vmem>>, vector<64x1xf32>
    %59 = vector.broadcast %58 : vector<64x1xf32> to vector<64x256xf32>
    %60 = arith.addf %57, %59 : vector<64x256xf32>
    %cst_31 = arith.constant 0.000000e+00 : f32
    %61 = vector.broadcast %cst_31 : f32 to vector<64x256xf32>
    %62 = arith.maximumf %60, %61 : vector<64x256xf32>
    %c0_32 = arith.constant 0 : index
    %c0_33 = arith.constant 0 : index
    %63 = vector.load %arg7[%c0_32, %c0_33] : memref<64x256xf32, #tpu.memory_space<vmem>>, vector<64x256xf32>
    tpu.vector_store %arg7[%c0_32, %c0_33], %62 {strides = array<i32>} : memref<64x256xf32, #tpu.memory_space<vmem>>, vector<64x256xf32>,
    %cst_34 = arith.constant 0.000000e+00 : f32
    %64 = vector.broadcast %cst_34 : f32 to vector<8x128xf32>
    %c0_35 = arith.constant 0 : index
    %c0_36 = arith.constant 0 : index
    %65 = vector.load %arg4[%c0_35, %c0_36] : memref<1x128xf32, #tpu.memory_space<vmem>>, vector<1x128xf32>
    %66 = vector.broadcast %65 : vector<1x128xf32> to vector<8x128xf32>
    %67 = arith.addf %64, %66 : vector<8x128xf32>
    %c0_37 = arith.constant 0 : index
    %c0_38 = arith.constant 0 : index
    %68 = vector.load %arg7[%c0_37, %c0_38] : memref<64x256xf32, #tpu.memory_space<vmem>>, vector<8x256xf32>
    %c0_39 = arith.constant 0 : index
    %c0_40 = arith.constant 0 : index
    %69 = vector.load %arg3[%c0_39, %c0_40] : memref<2048x128xf32, #tpu.memory_space<vmem>>, vector<256x128xf32>
    %cst_41 = arith.constant dense<0.000000e+00> : vector<8x128xf32>
    %70 = tpu.matmul %68, %69, %cst_41 {dimension_numbers = #tpu.dot_dimension_numbers<[1], [0], [0], [1], [0, 0, 1, 1], [], []>} : vector<8x256xf32>, vector<256x128xf32>, vector<8x128xf32> -> vector<8x128xf32>
    %71 = arith.addf %67, %70 : vector<8x128xf32>
    %c8_42 = arith.constant 8 : index
    %c0_43 = arith.constant 0 : index
    %72 = vector.load %arg7[%c8_42, %c0_43] : memref<64x256xf32, #tpu.memory_space<vmem>>, vector<8x256xf32>
    %c256 = arith.constant 256 : index
    %c0_44 = arith.constant 0 : index
    %73 = vector.load %arg3[%c256, %c0_44] : memref<2048x128xf32, #tpu.memory_space<vmem>>, vector<256x128xf32>
    %cst_45 = arith.constant dense<0.000000e+00> : vector<8x128xf32>
    %74 = tpu.matmul %72, %73, %cst_45 {dimension_numbers = #tpu.dot_dimension_numbers<[1], [0], [0], [1], [0, 0, 1, 1], [], []>} : vector<8x256xf32>, vector<256x128xf32>, vector<8x128xf32> -> vector<8x128xf32>
    %75 = arith.addf %71, %74 : vector<8x128xf32>
    %c16_46 = arith.constant 16 : index
    %c0_47 = arith.constant 0 : index
    %76 = vector.load %arg7[%c16_46, %c0_47] : memref<64x256xf32, #tpu.memory_space<vmem>>, vector<8x256xf32>
    %c512 = arith.constant 512 : index
    %c0_48 = arith.constant 0 : index
    %77 = vector.load %arg3[%c512, %c0_48] : memref<2048x128xf32, #tpu.memory_space<vmem>>, vector<256x128xf32>
    %cst_49 = arith.constant dense<0.000000e+00> : vector<8x128xf32>
    %78 = tpu.matmul %76, %77, %cst_49 {dimension_numbers = #tpu.dot_dimension_numbers<[1], [0], [0], [1], [0, 0, 1, 1], [], []>} : vector<8x256xf32>, vector<256x128xf32>, vector<8x128xf32> -> vector<8x128xf32>
    %79 = arith.addf %75, %78 : vector<8x128xf32>
    %c24_50 = arith.constant 24 : index
    %c0_51 = arith.constant 0 : index
    %80 = vector.load %arg7[%c24_50, %c0_51] : memref<64x256xf32, #tpu.memory_space<vmem>>, vector<8x256xf32>
    %c768 = arith.constant 768 : index
    %c0_52 = arith.constant 0 : index
    %81 = vector.load %arg3[%c768, %c0_52] : memref<2048x128xf32, #tpu.memory_space<vmem>>, vector<256x128xf32>
    %cst_53 = arith.constant dense<0.000000e+00> : vector<8x128xf32>
    %82 = tpu.matmul %80, %81, %cst_53 {dimension_numbers = #tpu.dot_dimension_numbers<[1], [0], [0], [1], [0, 0, 1, 1], [], []>} : vector<8x256xf32>, vector<256x128xf32>, vector<8x128xf32> -> vector<8x128xf32>
    %83 = arith.addf %79, %82 : vector<8x128xf32>
    %c32_54 = arith.constant 32 : index
    %c0_55 = arith.constant 0 : index
    %84 = vector.load %arg7[%c32_54, %c0_55] : memref<64x256xf32, #tpu.memory_space<vmem>>, vector<8x256xf32>
    %c1024 = arith.constant 1024 : index
    %c0_56 = arith.constant 0 : index
    %85 = vector.load %arg3[%c1024, %c0_56] : memref<2048x128xf32, #tpu.memory_space<vmem>>, vector<256x128xf32>
    %cst_57 = arith.constant dense<0.000000e+00> : vector<8x128xf32>
    %86 = tpu.matmul %84, %85, %cst_57 {dimension_numbers = #tpu.dot_dimension_numbers<[1], [0], [0], [1], [0, 0, 1, 1], [], []>} : vector<8x256xf32>, vector<256x128xf32>, vector<8x128xf32> -> vector<8x128xf32>
    %87 = arith.addf %83, %86 : vector<8x128xf32>
    %c40_58 = arith.constant 40 : index
    %c0_59 = arith.constant 0 : index
    %88 = vector.load %arg7[%c40_58, %c0_59] : memref<64x256xf32, #tpu.memory_space<vmem>>, vector<8x256xf32>
    %c1280 = arith.constant 1280 : index
    %c0_60 = arith.constant 0 : index
    %89 = vector.load %arg3[%c1280, %c0_60] : memref<2048x128xf32, #tpu.memory_space<vmem>>, vector<256x128xf32>
    %cst_61 = arith.constant dense<0.000000e+00> : vector<8x128xf32>
    %90 = tpu.matmul %88, %89, %cst_61 {dimension_numbers = #tpu.dot_dimension_numbers<[1], [0], [0], [1], [0, 0, 1, 1], [], []>} : vector<8x256xf32>, vector<256x128xf32>, vector<8x128xf32> -> vector<8x128xf32>
    %91 = arith.addf %87, %90 : vector<8x128xf32>
    %c48_62 = arith.constant 48 : index
    %c0_63 = arith.constant 0 : index
    %92 = vector.load %arg7[%c48_62, %c0_63] : memref<64x256xf32, #tpu.memory_space<vmem>>, vector<8x256xf32>
    %c1536 = arith.constant 1536 : index
    %c0_64 = arith.constant 0 : index
    %93 = vector.load %arg3[%c1536, %c0_64] : memref<2048x128xf32, #tpu.memory_space<vmem>>, vector<256x128xf32>
    %cst_65 = arith.constant dense<0.000000e+00> : vector<8x128xf32>
    %94 = tpu.matmul %92, %93, %cst_65 {dimension_numbers = #tpu.dot_dimension_numbers<[1], [0], [0], [1], [0, 0, 1, 1], [], []>} : vector<8x256xf32>, vector<256x128xf32>, vector<8x128xf32> -> vector<8x128xf32>
    %95 = arith.addf %91, %94 : vector<8x128xf32>
    %c56_66 = arith.constant 56 : index
    %c0_67 = arith.constant 0 : index
    %96 = vector.load %arg7[%c56_66, %c0_67] : memref<64x256xf32, #tpu.memory_space<vmem>>, vector<8x256xf32>
    %c1792 = arith.constant 1792 : index
    %c0_68 = arith.constant 0 : index
    %97 = vector.load %arg3[%c1792, %c0_68] : memref<2048x128xf32, #tpu.memory_space<vmem>>, vector<256x128xf32>
    %cst_69 = arith.constant dense<0.000000e+00> : vector<8x128xf32>
    %98 = tpu.matmul %96, %97, %cst_69 {dimension_numbers = #tpu.dot_dimension_numbers<[1], [0], [0], [1], [0, 0, 1, 1], [], []>} : vector<8x256xf32>, vector<256x128xf32>, vector<8x128xf32> -> vector<8x128xf32>
    %99 = arith.addf %95, %98 : vector<8x128xf32>
    %c0_70 = arith.constant 0 : index
    %c0_71 = arith.constant 0 : index
    %100 = vector.load %arg5[%c0_70, %c0_71] : memref<8x128xf32, #tpu.memory_space<vmem>>, vector<8x128xf32>
    tpu.vector_store %arg5[%c0_70, %c0_71], %99 {strides = array<i32>} : memref<8x128xf32, #tpu.memory_space<vmem>>, vector<8x128xf32>,
    return
  }
}

</mosaic_0001>

<bundles_post_ra>
// kernel: net_forward.1
= control target key start
LH: loop header
LB: loop body
LE: loop exit
PB: predicated region body
PF: predicated region fallthrough
CT: control target
= control target key end

     0   :  { %v20_v0 = vlaneseq  ;;  %v2020_v1 = vmov 0.0   ;;  %s2021_s18 = smov 2   ;;  %s2022_s19 = smov 18   ;;  %vm93_vm4 = vcmask 15360   ;;  %vm126_vm5 = vcmask 130048   ;;  %s3011_s0 = inlined_call_operand.vmem [shape: f32[8,384], index: 0, kind: input, shape index: {}]   ;;  %s3012_s2 = inlined_call_operand.vmem [shape: f32[64,1], index: 2, kind: input, shape index: {}]   ;;  %s3013_s3 = inlined_call_operand.vmem [shape: f32[2048,128], index: 3, kind: input, shape index: {}]   ;;  %s3014_s1 = inlined_call_operand.vmem [shape: f32[64,72], index: 1, kind: input, shape index: {}]   ;;  %s3015_s4 = inlined_call_operand.vmem [shape: f32[1,128], index: 4, kind: input, shape index: {}]   ;;  %s3016_s5 = inlined_call_operand.vmem [shape: f32[8,128], index: 5, kind: output, shape index: {}]  }
   0x1   :  { %444 = vmatprep.mubr.f32.mxu0 %v2020_v1  ;;  %v2076_v12 = vld [vmem:[%s3011_s0 + $0x8] sm:$0xff]  ;;  %v2081_v13 = vld [vmem:[%s3011_s0 + $0x10] sm:$0xff]  ;;  %s2023_s24 = smov 16   ;;  %s2024_s25 = smov 32   ;;  %v2091_v15 = vld [vmem:[%s3011_s0] sm:$0xff]  ;;  %vm207_vm6 = vcmask 261120  }
   0x2   :  { %v21_v2 = vand.u32 127, %v20_v0  ;;  %v2085_v14 = vpack.i.bf16 %v2081_v13, %v2076_v12  ;;  %s2025_s26 = smov 34   ;;  %s2026_s27 = smov 127   ;;  %vm176_vm7 = vcmask 146432   ;;  %vm77_vm8 = vcmask 1039360  }
   0x3   :  { %s2027_s30 = smov 111   ;;  %s2028_s0 = smov 126   ;;  %vm257_vm9 = vcmask 277504   ;;  %vm110_vm10 = vcmask 1031168   ;;  %vm143_vm11 = vcmask 916480   ;;  %vm162_vm12 = vcmask 908288  }
   0x4   :  { %v22_v3 = vadd.s32 128, %v21_v2  ;;  %v27_v4 = vand.u32 15, %v21_v2  ;;  %s2029_s6 = smov 112   ;;  %s2030_s7 = smov 110   ;;  %v2034_v2 = vmov 0   ;;  %vm193_vm13 = vcmask 900096  }
   0x5   :  { %s2031_s8 = smov 96   ;;  %s2032_s9 = smov 94   ;;  %2018 = vset.pattern.permute.xlu0 %v2034_v2  ;;  %2019 = vset.pattern.permute.xlu1 %v2034_v2  ;;  %vm224_vm14 = vcmask 785408   ;;  %vm243_vm15 = vcmask 777216  }
   0x6   :  { %v34_v5 = vand.u32 15, %v22_v3  ;;  %vm53_vm0 = vcmp.ne.s32.totalorder %v27_v4, 15  ;;  %vm47_vm1 = vcmp.ne.s32.totalorder %v27_v4, 0  ;;  %s2033_s10 = smov 95   ;;  %v307_v3 = vld [vmem:[%s3012_s2] sm:$0xff]  ;;  %v308_v4 = vld [vmem:[%s3012_s2 + $0x8] sm:$0xff] }
   0x7   :  { %v1380_v6 = vsel %vm53_vm0, 1.0, %v2020_v1  ;;  %v2069_v8 = vsel %vm47_vm1, 1.0, %v2020_v1  ;;  %vm274_vm0 = vcmask 769024   ;;  %vm355_vm1 = vcmask 588800  }
   0x8   :  { %vm54_vm2 = vcmp.ne.s32.totalorder %v34_v5, 15  ;;  %vm48_vm3 = vcmp.ne.s32.totalorder %v34_v5, 0  ;;  %v61_v47 = vmul.f32 %v2069_v8, %v2091_v15  ;;  %v310_v5 = vld [vmem:[%s3012_s2 + $0x18] sm:$0xff] }
   0x9   :  { %v1381_v7 = vsel %vm54_vm2, 1.0, %v2020_v1  ;;  %v1379_v9 = vsel %vm48_vm3, 1.0, %v2020_v1 }
   0xa   :  { %v1958_v10 = vpack.i.bf16 %v1381_v7, %v1380_v6  ;;  %v1963_v11 = vpack.i.bf16 %v1379_v9, %v2069_v8  ;;  %v62_v34 = vmul.f32 %v1379_v9, %v2076_v12  ;;  %v309_v6 = vld [vmem:[%s3012_s2 + $0x10] sm:$0xff]  ;;  %v551_v7 = vld [vmem:[%s3013_s3 + $0x80] sm:$0xff]  ;;  %v552_v8 = vld [vmem:[%s3013_s3 + $0x88] sm:$0xff] }
   0xb   :  { %v535_v9 = vld [vmem:[%s3013_s3] sm:$0xff] }
   0xc   :  { %1959 = vrot.lane.b32.xlu0 %v1958_v10, %s2021_s18  ;;  %1969 = vrot.lane.b32.xlu1 %v1958_v10, %s2022_s19 }
  0x10   :  { %1964 = vrot.lane.b32.xlu0 %v1963_v11, %s2023_s24  ;;  %1974 = vrot.lane.b32.xlu1 %v1963_v11, %s2024_s25  ;;  %v1687_v11 = vpack.c.bf16 %v552_v8, %v551_v7 }
  0x12   :  { %1688 = vmatprep.subr.bf16.mxu1 %v1687_v11 }
  0x14   :  { %1979 = vrot.lane.b32.xlu0 %v1958_v10, %s2025_s26  ;;  %1984 = vrot.lane.b32.xlu1 %v2085_v14, %s2026_s27  ;;  %v536_v10 = vld [vmem:[%s3013_s3 + $0x8] sm:$0xff] }
  0x18   :  { %1989 = vrot.lane.b32.xlu1 %v2085_v14, %s2027_s30  ;;  %71 = vrot.lane.b32.xlu0 %v2091_v15, %s2026_s27 }
  0x1c   :  { %156 = vrot.lane.b32.xlu1 %v2091_v15, %s2027_s30 }
  0x7e   :  { %v1960_v16 = vpop.permute.xlu0 %1959  ;;  %v1970_v17 = vpop.permute.xlu1 %1969 }
  0x7f   :  { %v1962_v18 = vunpack.i.h.bf16 %v1960_v16  ;;  %v1961_v19 = vunpack.i.l.bf16 %v1960_v16  ;;  %v1971_v24 = vunpack.i.l.bf16 %v1970_v17  ;;  %v1972_v36 = vunpack.i.h.bf16 %v1970_v17  ;;  %v537_v16 = vld [vmem:[%s3013_s3 + $0x10] sm:$0xff]  ;;  %v538_v17 = vld [vmem:[%s3013_s3 + $0x18] sm:$0xff] }
  0x81   :  { %v94_v20 = vsel %vm93_vm4, %v1961_v19, %v1962_v18  ;;  %v98_v21 = vmul.f32 %v1961_v19, %v2091_v15  ;;  %v100_v22 = vmul.f32 %v1962_v18, %v2081_v13  ;;  %v181_v37 = vmul.f32 %v1971_v24, %v2091_v15  ;;  %v312_v18 = vld [vmem:[%s3012_s2 + $0x28] sm:$0xff]  ;;  %v311_v19 = vld [vmem:[%s3012_s2 + $0x20] sm:$0xff] }
  0x82   :  { %v1965_v23 = vpop.permute.xlu0 %1964  ;;  %v99_v25 = vmul.f32 %v94_v20, %v2076_v12  ;;  %v1975_v26 = vpop.permute.xlu1 %1974  ;;  %v177_v51 = vsel %vm176_vm7, %v1971_v24, %v1972_v36  ;;  %v183_v58 = vmul.f32 %v1972_v36, %v2081_v13  ;;  %v555_v20 = vld [vmem:[%s3013_s3 + $0xa0] sm:$0xff] }
  0x83   :  { %v1967_v27 = vunpack.i.h.bf16 %v1965_v23  ;;  %v1966_v28 = vunpack.i.l.bf16 %v1965_v23  ;;  %104 = vrot.lane.b32.xlu1 %v98_v21, %s2028_s0  ;;  %v1977_v29 = vunpack.i.h.bf16 %v1975_v26  ;;  %v1976_v30 = vunpack.i.l.bf16 %v1975_v26  ;;  %v539_v24 = vld [vmem:[%s3013_s3 + $0x20] sm:$0xff]  ;;  %v557_v26 = vld [vmem:[%s3013_s3 + $0xb0] sm:$0xff] }
  0x84   :  { %v1993_v31 = vpack.i.bf16 %v100_v22, %v99_v25  ;;  %v182_v60 = vmul.f32 %v177_v51, %v2076_v12  ;;  %v1693_v21 = vpack.c.bf16 %v538_v17, %v537_v16  ;;  %v556_v22 = vld [vmem:[%s3013_s3 + $0xa8] sm:$0xff] }
  0x85   :  { %v131_v32 = vmul.f32 %v1966_v28, %v2091_v15  ;;  %v208_v33 = vsel %vm207_vm6, %v1976_v30, %v1977_v29  ;;  %v127_v35 = vsel %vm126_vm5, %v1966_v28, %v1967_v27  ;;  %v212_v38 = vmul.f32 %v1976_v30, %v2091_v15  ;;  %v540_v25 = vld [vmem:[%s3013_s3 + $0x28] sm:$0xff]  ;;  %v314_v28 = vld [vmem:[%s3012_s2 + $0x38] sm:$0xff] }
  0x86   :  { %v1980_v39 = vpop.permute.xlu0 %1979  ;;  %v1985_v40 = vpop.permute.xlu1 %1984  ;;  %v214_v41 = vmul.f32 %v1977_v29, %v2081_v13  ;;  %v213_v42 = vmul.f32 %v208_v33, %v2076_v12  ;;  %v133_v48 = vmul.f32 %v1967_v27, %v2081_v13  ;;  %v132_v49 = vmul.f32 %v127_v35, %v2076_v12  ;;  %v558_v27 = vld [vmem:[%s3013_s3 + $0xb8] sm:$0xff]  ;;  %v313_v29 = vld [vmem:[%s3012_s2 + $0x30] sm:$0xff]  ;;  %v560_v35 = vld [vmem:[%s3013_s3 + $0xc8] sm:$0xff] }
  0x87   :  { %1994 = vrot.lane.b32.xlu1 %v1993_v31, %s2028_s0  ;;  %137 = vrot.lane.b32.xlu0 %v131_v32, %s2029_s6  ;;  %v1987_v43 = vunpack.i.h.bf16 %v1985_v40  ;;  %v1986_v44 = vunpack.i.l.bf16 %v1985_v40  ;;  %v1982_v45 = vunpack.i.h.bf16 %v1980_v39  ;;  %v1981_v46 = vunpack.i.l.bf16 %v1980_v39  ;;  %v541_v32 = vld [vmem:[%s3013_s3 + $0x30] sm:$0xff]  ;;  %v542_v33 = vld [vmem:[%s3013_s3 + $0x38] sm:$0xff] }
  0x88   :  { %v2013_v54 = vpack.i.bf16 %v214_v41, %v213_v42  ;;  %v1998_v59 = vpack.i.bf16 %v133_v48, %v132_v49  ;;  %v2003_v62 = vpack.i.bf16 %v183_v58, %v182_v60  ;;  %v1695_v23 = vpack.c.bf16 %v556_v22, %v555_v20  ;;  %v544_v39 = vld [vmem:[%s3013_s3 + $0x48] sm:$0xff]  ;;  %v561_v40 = vld [vmem:[%s3013_s3 + $0xd0] sm:$0xff]  ;;  %v562_v41 = vld [vmem:[%s3013_s3 + $0xd8] sm:$0xff] }
  0x89   :  { %v79_v50 = vsel %vm77_vm8, %v1986_v44, %v1987_v43  ;;  %v258_v56 = vsel %vm257_vm9, %v1981_v46, %v1982_v45  ;;  %v262_v63 = vmul.f32 %v1981_v46, %v2091_v15  ;;  %v264_v0 = vmul.f32 %v1982_v45, %v2081_v13  ;;  %v553_v13 = vld [vmem:[%s3013_s3 + $0x90] sm:$0xff]  ;;  %v546_v45 = vld [vmem:[%s3013_s3 + $0x58] sm:$0xff]  ;;  %v563_v46 = vld [vmem:[%s3013_s3 + $0xe0] sm:$0xff] }
  0x8a   :  { %v72_v52 = vpop.permute.xlu0 %71  ;;  %v1671_v53 = vpack.c.bf16 %v79_v50, %v62_v34  ;;  %v263_v61 = vmul.f32 %v258_v56, %v2076_v12  ;;  %v1689_v12 = vpack.c.bf16 %v536_v10, %v535_v9  ;;  %v1697_v30 = vpack.c.bf16 %v540_v25, %v539_v24  ;;  %v559_v34 = vld [vmem:[%s3013_s3 + $0xc0] sm:$0xff]  ;;  %v548_v51 = vld [vmem:[%s3013_s3 + $0x68] sm:$0xff] }
  0x8b   :  { %187 = vrot.lane.b32.xlu0 %v181_v37, %s2030_s7  ;;  %218 = vrot.lane.b32.xlu1 %v212_v38, %s2031_s8  ;;  %v78_v55 = vsel %vm77_vm8, %v72_v52, %v1986_v44  ;;  %v1699_v31 = vpack.c.bf16 %v558_v27, %v557_v26  ;;  %v1701_v36 = vpack.c.bf16 %v542_v33, %v541_v32  ;;  %v543_v38 = vld [vmem:[%s3013_s3 + $0x40] sm:$0xff]  ;;  %v545_v44 = vld [vmem:[%s3013_s3 + $0x50] sm:$0xff] }
  0x8c   :  { %1672 = vmatprep.subr.bf16.mxu0 %v1671_v53  ;;  %v1673_v57 = vpack.c.bf16 %v78_v55, %v61_v47  ;;  %1690 = vmatpush3.bf16.msra.mxu1 %v1689_v12  ;;  %v1703_v37 = vpack.c.bf16 %v560_v35, %v559_v34  ;;  %v1705_v42 = vpack.c.bf16 %v544_v39, %v543_v38  ;;  %v564_v47 = vld [vmem:[%s3013_s3 + $0xe8] sm:$0xff]  ;;  %v547_v50 = vld [vmem:[%s3013_s3 + $0x60] sm:$0xff]  ;;  %v1990_v53 = vpop.permute.xlu1 %1989  ;;  %v658_v39 = vld [vmem:[%s3013_s3 + $0x190] sm:$0xff] }
  0x8d   :  { %v1707_v43 = vpack.c.bf16 %v562_v41, %v561_v40  ;;  %v1709_v48 = vpack.c.bf16 %v546_v45, %v545_v44  ;;  %v1711_v49 = vpack.c.bf16 %v564_v47, %v563_v46  ;;  %v1713_v52 = vpack.c.bf16 %v548_v51, %v547_v50  ;;  %v656_v33 = vld [vmem:[%s3013_s3 + $0x180] sm:$0xff]  ;;  %v657_v34 = vld [vmem:[%s3013_s3 + $0x188] sm:$0xff]  ;;  %v659_v40 = vld [vmem:[%s3013_s3 + $0x198] sm:$0xff] }
  0x8e   :  { %1674 = vmatpush1.bf16.msra.mxu0 %v1673_v57  ;;  %v1992_v2 = vunpack.i.h.bf16 %v1990_v53  ;;  %v640_v35 = vld [vmem:[%s3013_s3 + $0x100] sm:$0xff]  ;;  %v1723_v46 = vpack.c.bf16 %v659_v40, %v658_v39  ;;  %v642_v47 = vld [vmem:[%s3013_s3 + $0x110] sm:$0xff]  ;;  %v661_v50 = vld [vmem:[%s3013_s3 + $0x1a8] sm:$0xff] }
  0x8f   :  { %1999 = vrot.lane.b32.xlu0 %v1998_v59, %s2029_s6  ;;  %2014 = vrot.lane.b32.xlu1 %v2013_v54, %s2031_s8  ;;  %v282_v51 = vld [vmem:[%s3014_s1 + $0x8] sm:$0xff] }
  0x90   :  { %v157_v54 = vpop.permute.xlu1 %156  ;;  %v867_v39 = vld [vmem:[%s3013_s3 + $0x388] sm:$0xff] }
  0x93   :  { %2004 = vrot.lane.b32.xlu0 %v2003_v62, %s2030_s7  ;;  %270 = vrot.lane.b32.xlu1 %v263_v61, %s2032_s9 }
  0x97   :  { %2009 = vrot.lane.b32.xlu0 %v2085_v14, %s2033_s10  ;;  %268 = vrot.lane.b32.xlu1 %v262_v63, %s2032_s9  ;;  %v554_v14 = vld [vmem:[%s3013_s3 + $0x98] sm:$0xff] }
  0x9b   :  { %237 = vrot.lane.b32.xlu0 %v2091_v15, %s2033_s10  ;;  %322 = vperm.xlu1 %2019, %v308_v4   ;;  %v1691_v15 = vpack.c.bf16 %v554_v14, %v553_v13 }
  0x9d   :  { %1692 = vmatprep.subr.bf16.mxu1 %v1691_v15 }
  0x9e   :  { %1694 = vmatpush3.bf16.msra.mxu1 %v1693_v21 }
  0x9f   :  { %272 = vrot.lane.b32.xlu0 %v264_v0, %s2032_s9  ;;  %327 = vperm.xlu1 %2019, %v309_v6  }
  0xa0   :  { %1696 = vmatprep.subr.bf16.mxu1 %v1695_v23 }
  0xa2   :  { %1698 = vmatpush3.bf16.msra.mxu1 %v1697_v30 }
  0xa3   :  { %317 = vperm.xlu0 %2018, %v307_v3   ;;  %337 = vperm.xlu1 %2019, %v311_v19   ;;  %v1991_v3 = vunpack.i.l.bf16 %v1990_v53 }
  0xa4   :  { %1700 = vmatprep.subr.bf16.mxu1 %v1699_v31 }
  0xa5   :  { %v164_v15 = vsel %vm162_vm12, %v1991_v3, %v1992_v2  ;;  %v163_v16 = vsel %vm162_vm12, %v157_v54, %v1991_v3  ;;  %v644_v54 = vld [vmem:[%s3013_s3 + $0x120] sm:$0xff]  ;;  %v284_v2 = vld [vmem:[%s3014_s1 + $0x18] sm:$0xff] }
  0xa6   :  { %1702 = vmatpush3.bf16.msra.mxu1 %v1701_v36  ;;  %v641_v36 = vld [vmem:[%s3013_s3 + $0x108] sm:$0xff] }
  0xa7   :  { %332 = vperm.xlu0 %2018, %v310_v5   ;;  %347 = vperm.xlu1 %2019, %v313_v29   ;;  %v1721_v44 = vpack.c.bf16 %v641_v36, %v640_v35  ;;  %v655_v35 = vld [vmem:[%s3013_s3 + $0x178] sm:$0xff] }
  0xa8   :  { %1704 = vmatprep.subr.bf16.mxu1 %v1703_v37 }
  0xaa   :  { %1706 = vmatpush3.bf16.msra.mxu1 %v1705_v42  ;;  %v1719_v42 = vpack.c.bf16 %v657_v34, %v656_v33  ;;  %v762_v33 = vld [vmem:[%s3013_s3 + $0x288] sm:$0xff]  ;;  %v654_v34 = vld [vmem:[%s3013_s3 + $0x170] sm:$0xff] }
  0xab   :  { %342 = vperm.xlu0 %2018, %v312_v18   ;;  %1708 = vmatprep.subr.bf16.mxu1 %v1707_v43  ;;  %v281_v43 = vld [vmem:[%s3014_s1] sm:$0xff] }
  0xae   :  { %1710 = vmatpush3.bf16.msra.mxu1 %v1709_v48  ;;  %v643_v48 = vld [vmem:[%s3013_s3 + $0x118] sm:$0xff] }
  0xaf   :  { %352 = vperm.xlu0 %2018, %v314_v28   ;;  %1712 = vmatprep.subr.bf16.mxu1 %v1711_v49  ;;  %v660_v49 = vld [vmem:[%s3013_s3 + $0x1a0] sm:$0xff] }
  0xb0   :  { %v1727_v53 = vpack.c.bf16 %v661_v50, %v660_v49  ;;  %v764_v49 = vld [vmem:[%s3013_s3 + $0x298] sm:$0xff] }
  0xb2   :  { %1714 = vmatpush3.bf16.msra.mxu1 %v1713_v52  ;;  %v1725_v52 = vpack.c.bf16 %v643_v48, %v642_v47  ;;  %v763_v48 = vld [vmem:[%s3013_s3 + $0x290] sm:$0xff] }
  0xf5   :  { %v105_v55 = vpop.permute.xlu1 %104 }
  0xf9   :  { %v138_v56 = vpop.permute.xlu0 %137  ;;  %v1995_v57 = vpop.permute.xlu1 %1994 }
  0xfa   :  { %v1997_v60 = vunpack.i.h.bf16 %v1995_v57  ;;  %v1996_v61 = vunpack.i.l.bf16 %v1995_v57  ;;  %v663_v57 = vld [vmem:[%s3013_s3 + $0x1b8] sm:$0xff] }
  0xfc   :  { %v112_v4 = vsel %vm110_vm10, %v1996_v61, %v1997_v60  ;;  %v111_v6 = vsel %vm110_vm10, %v105_v55, %v1996_v61  ;;  %v645_v55 = vld [vmem:[%s3013_s3 + $0x128] sm:$0xff]  ;;  %v646_v61 = vld [vmem:[%s3013_s3 + $0x130] sm:$0xff] }
  0xfd   :  { %v188_v58 = vpop.permute.xlu0 %187  ;;  %v219_v59 = vpop.permute.xlu1 %218 }
 0x101   :  { %v2000_v62 = vpop.permute.xlu0 %1999  ;;  %v2015_v8 = vpop.permute.xlu1 %2014 }
 0x102   :  { %v2002_v63 = vunpack.i.h.bf16 %v2000_v62  ;;  %v2001_v0 = vunpack.i.l.bf16 %v2000_v62  ;;  %v2017_v12 = vunpack.i.h.bf16 %v2015_v8  ;;  %v2016_v17 = vunpack.i.l.bf16 %v2015_v8  ;;  %v647_v62 = vld [vmem:[%s3013_s3 + $0x138] sm:$0xff] }
 0x103   :  { %v1733_v3 = vpack.c.bf16 %v647_v62, %v646_v61  ;;  %v667_v8 = vld [vmem:[%s3013_s3 + $0x1d8] sm:$0xff]  ;;  %v851_v61 = vld [vmem:[%s3013_s3 + $0x308] sm:$0xff]  ;;  %v765_v62 = vld [vmem:[%s3013_s3 + $0x2a0] sm:$0xff] }
 0x104   :  { %v145_v5 = vsel %vm143_vm11, %v2001_v0, %v2002_v63  ;;  %v144_v7 = vsel %vm143_vm11, %v138_v56, %v2001_v0  ;;  %v226_v25 = vsel %vm224_vm14, %v2016_v17, %v2017_v12  ;;  %v225_v30 = vsel %vm224_vm14, %v219_v59, %v2016_v17  ;;  %v662_v56 = vld [vmem:[%s3013_s3 + $0x1b0] sm:$0xff]  ;;  %v664_v63 = vld [vmem:[%s3013_s3 + $0x1c0] sm:$0xff]  ;;  %v665_v0 = vld [vmem:[%s3013_s3 + $0x1c8] sm:$0xff] }
 0x105   :  { %v2005_v9 = vpop.permute.xlu0 %2004  ;;  %v1675_v10 = vpack.c.bf16 %v145_v5, %v112_v4  ;;  %v1677_v11 = vpack.c.bf16 %v144_v7, %v111_v6  ;;  %v271_v26 = vpop.permute.xlu1 %270  ;;  %v1729_v59 = vpack.c.bf16 %v645_v55, %v644_v54  ;;  %v1731_v60 = vpack.c.bf16 %v663_v57, %v662_v56  ;;  %v648_v5 = vld [vmem:[%s3013_s3 + $0x140] sm:$0xff]  ;;  %v649_v6 = vld [vmem:[%s3013_s3 + $0x148] sm:$0xff]  ;;  %v666_v7 = vld [vmem:[%s3013_s3 + $0x1d0] sm:$0xff] }
 0x106   :  { %v2007_v13 = vunpack.i.h.bf16 %v2005_v9  ;;  %v2006_v14 = vunpack.i.l.bf16 %v2005_v9  ;;  %v1735_v4 = vpack.c.bf16 %v665_v0, %v664_v63  ;;  %v285_v9 = vld [vmem:[%s3014_s1 + $0x20] sm:$0xff]  ;;  %v650_v12 = vld [vmem:[%s3013_s3 + $0x150] sm:$0xff]  ;;  %v288_v17 = vld [vmem:[%s3014_s1 + $0x38] sm:$0xff] }
 0x107   :  { %1676 = vmatprep.subr.bf16.mxu0 %v1675_v10  ;;  %v1737_v10 = vpack.c.bf16 %v649_v6, %v648_v5  ;;  %v747_v54 = vld [vmem:[%s3013_s3 + $0x210] sm:$0xff]  ;;  %v748_v55 = vld [vmem:[%s3013_s3 + $0x218] sm:$0xff]  ;;  %v766_v0 = vld [vmem:[%s3013_s3 + $0x2a8] sm:$0xff] }
 0x108   :  { %1678 = vmatpush1.bf16.msra.mxu0 %v1677_v11  ;;  %v195_v18 = vsel %vm193_vm13, %v2006_v14, %v2007_v13  ;;  %v194_v19 = vsel %vm193_vm13, %v188_v58, %v2006_v14  ;;  %v283_v58 = vld [vmem:[%s3014_s1 + $0x10] sm:$0xff]  ;;  %v1739_v11 = vpack.c.bf16 %v667_v8, %v666_v7  ;;  %v651_v13 = vld [vmem:[%s3013_s3 + $0x158] sm:$0xff]  ;;  %v286_v14 = vld [vmem:[%s3014_s1 + $0x28] sm:$0xff]  ;;  %v1757_v6 = vpack.c.bf16 %v748_v55, %v747_v54 }
 0x109   :  { %v2010_v20 = vpop.permute.xlu0 %2009  ;;  %v1679_v21 = vpack.c.bf16 %v195_v18, %v164_v15  ;;  %v1681_v22 = vpack.c.bf16 %v194_v19, %v163_v16  ;;  %v269_v37 = vpop.permute.xlu1 %268  ;;  %v1741_v15 = vpack.c.bf16 %v651_v13, %v650_v12  ;;  %v287_v16 = vld [vmem:[%s3014_s1 + $0x30] sm:$0xff]  ;;  %v566_v19 = vld [vmem:[%s3013_s3 + $0xf8] sm:$0xff]  ;;  %v749_v8 = vld [vmem:[%s3013_s3 + $0x220] sm:$0xff]  ;;  %v1759_v13 = vpack.c.bf16 %v766_v0, %v765_v62 }
 0x10a   :  { %v2012_v23 = vunpack.i.h.bf16 %v2010_v20  ;;  %v2011_v24 = vunpack.i.l.bf16 %v2010_v20  ;;  %v275_v45 = vsel %vm274_vm0, %v269_v37, %v271_v26  ;;  %v565_v18 = vld [vmem:[%s3013_s3 + $0xf0] sm:$0xff]  ;;  %v668_v20 = vld [vmem:[%s3013_s3 + $0x1e0] sm:$0xff]  ;;  %v1749_v37 = vpack.c.bf16 %v655_v35, %v654_v34  ;;  %v770_v35 = vld [vmem:[%s3013_s3 + $0x2c8] sm:$0xff] }
 0x10b   :  { %1680 = vmatprep.subr.bf16.mxu0 %v1679_v21  ;;  %v1715_v21 = vpack.c.bf16 %v566_v19, %v565_v18  ;;  %v768_v19 = vld [vmem:[%s3013_s3 + $0x2b8] sm:$0xff]  ;;  %v859_v62 = vld [vmem:[%s3013_s3 + $0x348] sm:$0xff] }
 0x10c   :  { %1682 = vmatpush1.bf16.msra.mxu0 %v1681_v22  ;;  %v245_v27 = vsel %vm243_vm15, %v2011_v24, %v2012_v23  ;;  %v549_v22 = vld [vmem:[%s3013_s3 + $0x70] sm:$0xff]  ;;  %v550_v23 = vld [vmem:[%s3013_s3 + $0x78] sm:$0xff]  ;;  %v774_v0 = vld [vmem:[%s3013_s3 + $0x2e8] sm:$0xff] }
 0x10d   :  { %v238_v28 = vpop.permute.xlu0 %237  ;;  %v1683_v29 = vpack.c.bf16 %v245_v27, %v226_v25  ;;  %v1717_v25 = vpack.c.bf16 %v550_v23, %v549_v22  ;;  %v653_v27 = vld [vmem:[%s3013_s3 + $0x168] sm:$0xff]  ;;  %1716 = vmatprep.subr.bf16.mxu1 %v1715_v21 }
 0x10e   :  { %v244_v31 = vsel %vm243_vm15, %v238_v28, %v2011_v24  ;;  %v871_v21 = vld [vmem:[%s3013_s3 + $0x3a8] sm:$0xff] }
 0x10f   :  { %v1685_v32 = vpack.c.bf16 %v244_v31, %v225_v30  ;;  %1684 = vmatprep.subr.bf16.mxu0 %v1683_v29  ;;  %1718 = vmatpush3.bf16.msra.mxu1 %v1717_v25  ;;  %v670_v29 = vld [vmem:[%s3013_s3 + $0x1f0] sm:$0xff]  ;;  %v671_v30 = vld [vmem:[%s3013_s3 + $0x1f8] sm:$0xff]  ;;  %v761_v31 = vld [vmem:[%s3013_s3 + $0x280] sm:$0xff] }
 0x110   :  { %v1751_v36 = vpack.c.bf16 %v762_v33, %v761_v31  ;;  %v751_v25 = vld [vmem:[%s3013_s3 + $0x230] sm:$0xff]  ;;  %v854_v31 = vld [vmem:[%s3013_s3 + $0x320] sm:$0xff] }
 0x111   :  { %v273_v38 = vpop.permute.xlu0 %272  ;;  %1686 = vmatpush1.bf16.msra.mxu0 %v1685_v32  ;;  %v1747_v32 = vpack.c.bf16 %v671_v30, %v670_v29  ;;  %v769_v33 = vld [vmem:[%s3013_s3 + $0x2c0] sm:$0xff] }
 0x112   :  { %v276_v41 = vsel %vm274_vm0, %v271_v26, %v273_v38  ;;  %v652_v26 = vld [vmem:[%s3013_s3 + $0x160] sm:$0xff]  ;;  %1752 = vmatprep.subr.bf16.mxu1 %v1751_v36  ;;  %v872_v36 = vld [vmem:[%s3013_s3 + $0x3b0] sm:$0xff] }
 0x113   :  { %396 = vmatprep.subr.mxu0 %v276_v41  ;;  %v1745_v28 = vpack.c.bf16 %v653_v27, %v652_v26  ;;  %v866_v38 = vld [vmem:[%s3013_s3 + $0x380] sm:$0xff]  ;;  %v752_v26 = vld [vmem:[%s3013_s3 + $0x238] sm:$0xff] }
 0x114   :  { %v1783_v40 = vpack.c.bf16 %v867_v39, %v866_v38 }
 0x115   :  { %397 = vmatpush1.msra.mxu0 %v275_v45  ;;  %v745_v45 = vld [vmem:[%s3013_s3 + $0x200] sm:$0xff] }
 0x116   :  { %1382 = vmatmul.mubr.msk.f32.vlgmr.msra.gmra.mrb[0].mxu0 %vm355_vm1, %v281_v43  ;;  %1720 = vmatprep.subr.bf16.mxu0 %v1719_v42 }
 0x117   :  { %450 = vmatprep.mubr.f32.mxu0 %v2020_v1  ;;  %1722 = vmatpush3.bf16.msra.mxu0 %v1721_v44 }
 0x118   :  { %1724 = vmatprep.subr.bf16.mxu0 %v1723_v46  ;;  %v746_v46 = vld [vmem:[%s3013_s3 + $0x208] sm:$0xff] }
 0x11a   :  { %1383 = vmatmul.mubr.msk.f32.gmra.mrb[2].mxu0 %vm355_vm1, %v282_v51  ;;  %v323_v50 = vpop.permute.xlu1 %322 }
 0x11b   :  { %456 = vmatprep.mubr.f32.mxu0 %v2020_v1  ;;  %1726 = vmatpush3.bf16.msra.mxu0 %v1725_v52 }
 0x11c   :  { %1728 = vmatprep.subr.bf16.mxu0 %v1727_v53  ;;  %v1753_v53 = vpack.c.bf16 %v746_v46, %v745_v45  ;;  %v1767_v45 = vpack.c.bf16 %v770_v35, %v769_v33  ;;  %v971_v33 = vld [vmem:[%s3013_s3 + $0x480] sm:$0xff] }
 0x11e   :  { %1384 = vmatmul.mubr.msk.f32.gmra.mrb[4].mxu0 %vm355_vm1, %v283_v58 }
 0x11f   :  { %462 = vmatprep.mubr.f32.mxu0 %v2020_v1  ;;  %1730 = vmatpush3.bf16.msra.mxu0 %v1729_v59  ;;  %v1755_v59 = vpack.c.bf16 %v764_v49, %v763_v48  ;;  %v857_v48 = vld [vmem:[%s3013_s3 + $0x338] sm:$0xff]  ;;  %v771_v49 = vld [vmem:[%s3013_s3 + $0x2d0] sm:$0xff] }
 0x120   :  { %1732 = vmatprep.subr.bf16.mxu0 %v1731_v60  ;;  %v850_v60 = vld [vmem:[%s3013_s3 + $0x300] sm:$0xff] }
 0x121   :  { %v1785_v7 = vpack.c.bf16 %v851_v61, %v850_v60  ;;  %v858_v61 = vld [vmem:[%s3013_s3 + $0x340] sm:$0xff] }
 0x122   :  { %1385 = vmatmul.mubr.msk.f32.gmra.mrb[6].mxu0 %vm355_vm1, %v284_v2  ;;  %v318_v41 = vpop.permute.xlu0 %317  ;;  %v868_v2 = vld [vmem:[%s3013_s3 + $0x390] sm:$0xff] }
 0x123   :  { %468 = vmatprep.mubr.f32.mxu0 %v2020_v1  ;;  %1734 = vmatpush3.bf16.msra.mxu0 %v1733_v3  ;;  %v869_v3 = vld [vmem:[%s3013_s3 + $0x398] sm:$0xff] }
 0x124   :  { %1736 = vmatprep.subr.bf16.mxu0 %v1735_v4 }
 0x126   :  { %1386 = vmatmul.mubr.msk.f32.gmra.mrb[8].mxu0 %vm355_vm1, %v285_v9  ;;  %v750_v9 = vld [vmem:[%s3013_s3 + $0x228] sm:$0xff]  ;;  %v2460_v27 = vpop.permute.xlu0 %332 }
 0x127   :  { %474 = vmatprep.mubr.f32.mxu0 %v2020_v1  ;;  %1738 = vmatpush3.bf16.msra.mxu0 %v1737_v10  ;;  %v2431_v10 = vpop.permute.xlu1 %327  ;;  %v1761_v23 = vpack.c.bf16 %v750_v9, %v749_v8  ;;  %v757_v8 = vld [vmem:[%s3013_s3 + $0x260] sm:$0xff]  ;;  %v758_v9 = vld [vmem:[%s3013_s3 + $0x268] sm:$0xff] }
 0x128   :  { %1740 = vmatprep.subr.bf16.mxu0 %v1739_v11 }
 0x12a   :  { %1387 = vmatmul.mubr.msk.f32.gmra.mrb[10].mxu0 %vm355_vm1, %v286_v14  ;;  %v1787_v14 = vpack.c.bf16 %v869_v3, %v868_v2  ;;  %v876_v2 = vld [vmem:[%s3013_s3 + $0x3d0] sm:$0xff]  ;;  %v877_v3 = vld [vmem:[%s3013_s3 + $0x3d8] sm:$0xff] }
 0x12b   :  { %480 = vmatprep.mubr.f32.mxu0 %v2020_v1  ;;  %1742 = vmatpush3.bf16.msra.mxu0 %v1741_v15  ;;  %v852_v15 = vld [vmem:[%s3013_s3 + $0x310] sm:$0xff] }
 0x12e   :  { %1388 = vmatmul.mubr.msk.f32.gmra.mrb[12].mxu0 %vm355_vm1, %v287_v16  ;;  %v853_v16 = vld [vmem:[%s3013_s3 + $0x318] sm:$0xff] }
 0x12f   :  { %486 = vmatprep.mubr.f32.mxu0 %v2020_v1  ;;  %v669_v1 = vld [vmem:[%s3013_s3 + $0x1e8] sm:$0xff] }
 0x130   :  { %v1743_v24 = vpack.c.bf16 %v669_v1, %v668_v20  ;;  %v870_v20 = vld [vmem:[%s3013_s3 + $0x3a0] sm:$0xff] }
 0x131   :  { %v1791_v30 = vpack.c.bf16 %v871_v21, %v870_v20  ;;  %v1777_v21 = vpack.c.bf16 %v758_v9, %v757_v8 }
 0x132   :  { %1389 = vmatmul.mubr.msk.f32.gmra.mrb[14].mxu0 %vm355_vm1, %v288_v17  ;;  %1744 = vmatprep.subr.bf16.mxu0 %v1743_v24  ;;  %v767_v17 = vld [vmem:[%s3013_s3 + $0x2b0] sm:$0xff]  ;;  %v1789_v24 = vpack.c.bf16 %v853_v16, %v852_v15  ;;  %v861_v15 = vld [vmem:[%s3013_s3 + $0x358] sm:$0xff] }
 0x133   :  { %1746 = vmatpush3.bf16.msra.mxu0 %v1745_v28  ;;  %v1763_v29 = vpack.c.bf16 %v768_v19, %v767_v17  ;;  %v775_v16 = vld [vmem:[%s3013_s3 + $0x2f0] sm:$0xff]  ;;  %v776_v17 = vld [vmem:[%s3013_s3 + $0x2f8] sm:$0xff]  ;;  %v879_v19 = vld [vmem:[%s3013_s3 + $0x3e8] sm:$0xff] }
 0x134   :  { %1748 = vmatprep.subr.bf16.mxu0 %v1747_v32  ;;  %v855_v32 = vld [vmem:[%s3013_s3 + $0x328] sm:$0xff] }
 0x137   :  { %1750 = vmatpush3.bf16.msra.mxu0 %v1749_v37  ;;  %v873_v37 = vld [vmem:[%s3013_s3 + $0x3b8] sm:$0xff] }
 0x138   :  { %1784 = vmatprep.subr.bf16.mxu0 %v1783_v40  ;;  %v1765_v40 = vpack.c.bf16 %v752_v26, %v751_v25  ;;  %v1795_v46 = vpack.c.bf16 %v873_v37, %v872_v36  ;;  %v1779_v26 = vpack.c.bf16 %v776_v17, %v775_v16  ;;  %v864_v37 = vld [vmem:[%s3013_s3 + $0x370] sm:$0xff]  ;;  %v978_v16 = vld [vmem:[%s3013_s3 + $0x4b8] sm:$0xff]  ;;  %v1080_v17 = vld [vmem:[%s3013_s3 + $0x5a0] sm:$0xff] }
 0x1e9   :  { %v446_v42 = vpop.f32.mrb[0].mxu0 }
 0x1ea   :  { %v447_v43 = vadd.f32 %v446_v42, %v318_v41  ;;  %v448_v44 = vpop.f32.mrb[1].mxu0  ;;  %v753_v42 = vld [vmem:[%s3013_s3 + $0x240] sm:$0xff] }
 0x1eb   :  { %v449_v47 = vadd.f32 %v448_v44, %v318_v41  ;;  %v1793_v41 = vpack.c.bf16 %v855_v32, %v854_v31  ;;  %v880_v31 = vld [vmem:[%s3013_s3 + $0x3f0] sm:$0xff]  ;;  %v881_v32 = vld [vmem:[%s3013_s3 + $0x3f8] sm:$0xff] }
 0x1ec   :  { %v493_v56 = vmax.f32 %v447_v43, 0.0  ;;  %v754_v43 = vld [vmem:[%s3013_s3 + $0x248] sm:$0xff] }
 0x1ed   :  { %v452_v51 = vpop.f32.mrb[2].mxu0  ;;  %v494_v52 = vmax.f32 %v449_v47, 0.0  ;;  %v856_v47 = vld [vmem:[%s3013_s3 + $0x330] sm:$0xff]  ;;  %v1769_v54 = vpack.c.bf16 %v754_v43, %v753_v42  ;;  %v865_v42 = vld [vmem:[%s3013_s3 + $0x378] sm:$0xff]  ;;  %v955_v43 = vld [vmem:[%s3013_s3 + $0x400] sm:$0xff] }
 0x1ee   :  { %v453_v57 = vadd.f32 %v452_v51, %v323_v50  ;;  %v454_v58 = vpop.f32.mrb[3].mxu0  ;;  %v874_v51 = vld [vmem:[%s3013_s3 + $0x3c0] sm:$0xff]  ;;  %v1797_v55 = vpack.c.bf16 %v857_v48, %v856_v47 }
 0x1ef   :  { %v455_v63 = vadd.f32 %v454_v58, %v323_v50  ;;  %631 = vmatprep.mubr.f32.mxu1 %v494_v52  ;;  %v772_v50 = vld [vmem:[%s3013_s3 + $0x2d8] sm:$0xff]  ;;  %v875_v52 = vld [vmem:[%s3013_s3 + $0x3c8] sm:$0xff]  ;;  %v1076_v48 = vld [vmem:[%s3013_s3 + $0x580] sm:$0xff] }
 0x1f0   :  { %632 = vmatmul.mubr.f32.vlgmr.msra.gmra.mrb[0].mxu1 %v493_v56  ;;  %v495_v11 = vmax.f32 %v453_v57, 0.0  ;;  %v755_v56 = vld [vmem:[%s3013_s3 + $0x250] sm:$0xff]  ;;  %v756_v57 = vld [vmem:[%s3013_s3 + $0x258] sm:$0xff]  ;;  %v1799_v60 = vpack.c.bf16 %v875_v52, %v874_v51 }
 0x1f1   :  { %v496_v4 = vmax.f32 %v455_v63, 0.0  ;;  %1754 = vmatpush3.bf16.msra.mxu1 %v1753_v53  ;;  %v2423_v5 = vpop.f32.mrb[4].mxu0  ;;  %v773_v63 = vld [vmem:[%s3013_s3 + $0x2e0] sm:$0xff]  ;;  %v957_v52 = vld [vmem:[%s3013_s3 + $0x410] sm:$0xff] }
 0x1f2   :  { %v460_v12 = vpop.f32.mrb[5].mxu0  ;;  %1756 = vmatprep.subr.bf16.mxu1 %v1755_v59  ;;  %v1771_v59 = vpack.c.bf16 %v772_v50, %v771_v49  ;;  %v1077_v49 = vld [vmem:[%s3013_s3 + $0x588] sm:$0xff]  ;;  %v1813_v50 = vpack.c.bf16 %v865_v42, %v864_v37  ;;  %v963_v37 = vld [vmem:[%s3013_s3 + $0x440] sm:$0xff]  ;;  %v1066_v42 = vld [vmem:[%s3013_s3 + $0x530] sm:$0xff] }
 0x1f3   :  { %v461_v18 = vadd.f32 %v460_v12, %v2431_v10  ;;  %736 = vmatprep.mubr.f32.mxu0 %v496_v4  ;;  %v1775_v12 = vpack.c.bf16 %v774_v0, %v773_v63  ;;  %v1078_v0 = vld [vmem:[%s3013_s3 + $0x590] sm:$0xff] }
 0x1f4   :  { %737 = vmatmul.mubr.f32.vlgmr.msra.gmra.mrb[16].mxu0 %v495_v11 }
 0x1f5   :  { %v498_v1 = vmax.f32 %v461_v18, 0.0  ;;  %1758 = vmatpush3.bf16.msra.mxu1 %v1757_v6  ;;  %1786 = vmatpush3.bf16.msra.mxu0 %v1785_v7  ;;  %v2452_v22 = vpop.f32.mrb[6].mxu0  ;;  %v1773_v6 = vpack.c.bf16 %v756_v57, %v755_v56  ;;  %v1801_v7 = vpack.c.bf16 %v859_v62, %v858_v61  ;;  %v878_v18 = vld [vmem:[%s3013_s3 + $0x3e0] sm:$0xff]  ;;  %v958_v56 = vld [vmem:[%s3013_s3 + $0x418] sm:$0xff]  ;;  %v1847_v61 = vpack.c.bf16 %v1077_v49, %v1076_v48 }
 0x1f6   :  { %v466_v28 = vpop.f32.mrb[7].mxu0  ;;  %1760 = vmatprep.subr.bf16.mxu1 %v1759_v13  ;;  %1788 = vmatprep.subr.bf16.mxu0 %v1787_v14  ;;  %v1803_v13 = vpack.c.bf16 %v877_v3, %v876_v2  ;;  %v860_v14 = vld [vmem:[%s3013_s3 + $0x350] sm:$0xff]  ;;  %v1060_v57 = vld [vmem:[%s3013_s3 + $0x500] sm:$0xff]  ;;  %v1079_v2 = vld [vmem:[%s3013_s3 + $0x598] sm:$0xff]  ;;  %v1821_v3 = vpack.c.bf16 %v958_v56, %v957_v52 }
 0x1f7   :  { %v467_v34 = vadd.f32 %v466_v28, %v2460_v27  ;;  %841 = vmatprep.mubr.f32.mxu1 %v498_v1  ;;  %v1805_v1 = vpack.c.bf16 %v861_v15, %v860_v14  ;;  %v1807_v28 = vpack.c.bf16 %v879_v19, %v878_v18  ;;  %v977_v14 = vld [vmem:[%s3013_s3 + $0x4b0] sm:$0xff]  ;;  %v1851_v15 = vpack.c.bf16 %v1079_v2, %v1078_v0  ;;  %v1081_v18 = vld [vmem:[%s3013_s3 + $0x5a8] sm:$0xff]  ;;  %v983_v56 = vld [vmem:[%s3013_s3 + $0x4e0] sm:$0xff] }
 0x1f9   :  { %v500_v38 = vmax.f32 %v467_v34, 0.0  ;;  %1762 = vmatpush3.bf16.msra.mxu1 %v1761_v23  ;;  %1790 = vmatpush3.bf16.msra.mxu0 %v1789_v24  ;;  %v2481_v39 = vpop.f32.mrb[8].mxu0  ;;  %v759_v23 = vld [vmem:[%s3013_s3 + $0x270] sm:$0xff]  ;;  %v760_v24 = vld [vmem:[%s3013_s3 + $0x278] sm:$0xff]  ;;  %v972_v34 = vld [vmem:[%s3013_s3 + $0x488] sm:$0xff] }
 0x1fa   :  { %v2489_v44 = vpop.f32.mrb[9].mxu0  ;;  %1764 = vmatprep.subr.bf16.mxu1 %v1763_v29  ;;  %1792 = vmatprep.subr.bf16.mxu0 %v1791_v30  ;;  %v862_v29 = vld [vmem:[%s3013_s3 + $0x360] sm:$0xff]  ;;  %v863_v30 = vld [vmem:[%s3013_s3 + $0x368] sm:$0xff]  ;;  %v1781_v35 = vpack.c.bf16 %v760_v24, %v759_v23  ;;  %v961_v23 = vld [vmem:[%s3013_s3 + $0x430] sm:$0xff] }
 0x1fb   :  { %946 = vmatprep.mubr.f32.mxu0 %v500_v38  ;;  %v1809_v36 = vpack.c.bf16 %v863_v30, %v862_v29  ;;  %v459_v38 = vadd.f32 %v2423_v5, %v2431_v10  ;;  %v973_v5 = vld [vmem:[%s3013_s3 + $0x490] sm:$0xff]  ;;  %v974_v10 = vld [vmem:[%s3013_s3 + $0x498] sm:$0xff]  ;;  %v1064_v29 = vld [vmem:[%s3013_s3 + $0x520] sm:$0xff] }
 0x1fc   :  { %v962_v24 = vld [vmem:[%s3013_s3 + $0x438] sm:$0xff]  ;;  %v1065_v30 = vld [vmem:[%s3013_s3 + $0x528] sm:$0xff] }
 0x1fd   :  { %1766 = vmatpush3.bf16.msra.mxu1 %v1765_v40  ;;  %1794 = vmatpush3.bf16.msra.mxu0 %v1793_v41  ;;  %v2509_v53 = vpop.f32.mrb[10].mxu0  ;;  %v1811_v40 = vpack.c.bf16 %v881_v32, %v880_v31  ;;  %v1815_v41 = vpack.c.bf16 %v972_v34, %v971_v33  ;;  %v979_v31 = vld [vmem:[%s3013_s3 + $0x4c0] sm:$0xff]  ;;  %v980_v32 = vld [vmem:[%s3013_s3 + $0x4c8] sm:$0xff]  ;;  %v1082_v33 = vld [vmem:[%s3013_s3 + $0x5b0] sm:$0xff] }
 0x1fe   :  { %v2517_v58 = vpop.f32.mrb[11].mxu0  ;;  %1768 = vmatprep.subr.bf16.mxu1 %v1767_v45  ;;  %1796 = vmatprep.subr.bf16.mxu0 %v1795_v46  ;;  %v956_v45 = vld [vmem:[%s3013_s3 + $0x408] sm:$0xff]  ;;  %v2607_v46 = vpop.permute.xlu1 %337  ;;  %v1083_v34 = vld [vmem:[%s3013_s3 + $0x5b8] sm:$0xff] }
 0x1ff   :  { %v473_v47 = vadd.f32 %v2489_v44, %v2607_v46  ;;  %v1817_v51 = vpack.c.bf16 %v956_v45, %v955_v43  ;;  %v465_v44 = vadd.f32 %v2452_v22, %v2460_v27  ;;  %v975_v22 = vld [vmem:[%s3013_s3 + $0x4a0] sm:$0xff]  ;;  %v976_v27 = vld [vmem:[%s3013_s3 + $0x4a8] sm:$0xff]  ;;  %v1067_v43 = vld [vmem:[%s3013_s3 + $0x538] sm:$0xff] }
 0x200   :  { %v1823_v9 = vpack.c.bf16 %v976_v27, %v975_v22  ;;  %v981_v45 = vld [vmem:[%s3013_s3 + $0x4d0] sm:$0xff]  ;;  %v1861_v49 = vpack.c.bf16 %v1067_v43, %v1066_v42 }
 0x201   :  { %1770 = vmatpush3.bf16.msra.mxu1 %v1769_v54  ;;  %1798 = vmatpush3.bf16.msra.mxu0 %v1797_v55  ;;  %v2537_v4 = vpop.f32.mrb[12].mxu0  ;;  %v497_v54 = vmax.f32 %v459_v38, 0.0  ;;  %v1819_v55 = vpack.c.bf16 %v974_v10, %v973_v5  ;;  %v502_v62 = vmax.f32 %v473_v47, 0.0  ;;  %v499_v8 = vmax.f32 %v465_v44, 0.0  ;;  %v964_v38 = vld [vmem:[%s3013_s3 + $0x448] sm:$0xff]  ;;  %v982_v5 = vld [vmem:[%s3013_s3 + $0x4d8] sm:$0xff] }
 0x202   :  { %v2545_v11 = vpop.f32.mrb[13].mxu0  ;;  %1772 = vmatprep.subr.bf16.mxu1 %v1771_v59  ;;  %1800 = vmatprep.subr.bf16.mxu0 %v1799_v60  ;;  %v1061_v59 = vld [vmem:[%s3013_s3 + $0x508] sm:$0xff]  ;;  %v2637_v60 = vpop.permute.xlu0 %342  ;;  %v1084_v10 = vld [vmem:[%s3013_s3 + $0x5c0] sm:$0xff]  ;;  %v1833_v48 = vpack.c.bf16 %v964_v38, %v963_v37  ;;  %v1835_v52 = vpack.c.bf16 %v982_v5, %v981_v45  ;;  %v1167_v43 = vld [vmem:[%s3013_s3 + $0x610] sm:$0xff] }
 0x203   :  { %v479_v63 = vadd.f32 %v2517_v58, %v2637_v60  ;;  %v960_v58 = vld [vmem:[%s3013_s3 + $0x428] sm:$0xff]  ;;  %v1068_v44 = vld [vmem:[%s3013_s3 + $0x540] sm:$0xff] }
 0x204   :  { %v1085_v47 = vld [vmem:[%s3013_s3 + $0x5c8] sm:$0xff]  ;;  %v1286_v38 = vld [vmem:[%s3013_s3 + $0x780] sm:$0xff] }
 0x205   :  { %1774 = vmatpush3.bf16.msra.mxu1 %v1773_v6  ;;  %1802 = vmatpush3.bf16.msra.mxu0 %v1801_v7  ;;  %v2565_v20 = vpop.f32.mrb[14].mxu0  ;;  %v1849_v6 = vpack.c.bf16 %v1061_v59, %v1060_v57  ;;  %v959_v7 = vld [vmem:[%s3013_s3 + $0x420] sm:$0xff]  ;;  %v504_v19 = vmax.f32 %v479_v63, 0.0  ;;  %v984_v57 = vld [vmem:[%s3013_s3 + $0x4e8] sm:$0xff]  ;;  %v1086_v59 = vld [vmem:[%s3013_s3 + $0x5d0] sm:$0xff] }
 0x206   :  { %v2573_v25 = vpop.f32.mrb[15].mxu0  ;;  %1776 = vmatprep.subr.bf16.mxu1 %v1775_v12  ;;  %1804 = vmatprep.subr.bf16.mxu0 %v1803_v13  ;;  %v1062_v12 = vld [vmem:[%s3013_s3 + $0x510] sm:$0xff]  ;;  %v1063_v13 = vld [vmem:[%s3013_s3 + $0x518] sm:$0xff]  ;;  %v968_v63 = vld [vmem:[%s3013_s3 + $0x468] sm:$0xff]  ;;  %v1839_v0 = vpack.c.bf16 %v984_v57, %v983_v56 }
 0x207   :  { %v1169_v57 = vld [vmem:[%s3013_s3 + $0x620] sm:$0xff] }
 0x209   :  { %1778 = vmatpush3.bf16.msra.mxu1 %v1777_v21  ;;  %1806 = vmatpush3.bf16.msra.mxu0 %v1805_v1  ;;  %v1825_v21 = vpack.c.bf16 %v960_v58, %v959_v7  ;;  %v1853_v1 = vpack.c.bf16 %v1063_v13, %v1062_v12  ;;  %v985_v7 = vld [vmem:[%s3013_s3 + $0x4f0] sm:$0xff]  ;;  %v986_v58 = vld [vmem:[%s3013_s3 + $0x4f8] sm:$0xff] }
 0x20a   :  { %1780 = vmatprep.subr.bf16.mxu1 %v1779_v26  ;;  %1808 = vmatprep.subr.bf16.mxu0 %v1807_v28  ;;  %v1827_v26 = vpack.c.bf16 %v978_v16, %v977_v14  ;;  %v1855_v28 = vpack.c.bf16 %v1081_v18, %v1080_v17  ;;  %v969_v14 = vld [vmem:[%s3013_s3 + $0x470] sm:$0xff]  ;;  %v1843_v16 = vpack.c.bf16 %v986_v58, %v985_v7  ;;  %v1072_v18 = vld [vmem:[%s3013_s3 + $0x560] sm:$0xff] }
 0x20d   :  { %1782 = vmatpush3.bf16.msra.mxu1 %v1781_v35  ;;  %1810 = vmatpush3.bf16.msra.mxu0 %v1809_v36  ;;  %v1829_v35 = vpack.c.bf16 %v962_v24, %v961_v23  ;;  %v1857_v36 = vpack.c.bf16 %v1065_v30, %v1064_v29  ;;  %v1181_v23 = vld [vmem:[%s3013_s3 + $0x680] sm:$0xff]  ;;  %v1182_v24 = vld [vmem:[%s3013_s3 + $0x688] sm:$0xff]  ;;  %v1074_v29 = vld [vmem:[%s3013_s3 + $0x570] sm:$0xff]  ;;  %v471_v30 = vadd.f32 %v2481_v39, %v2607_v46 }
 0x20e   :  { %1812 = vmatprep.subr.bf16.mxu0 %v1811_v40  ;;  %1816 = vmatprep.subr.bf16.mxu1 %v1815_v41  ;;  %v1831_v40 = vpack.c.bf16 %v980_v32, %v979_v31  ;;  %v1859_v41 = vpack.c.bf16 %v1083_v34, %v1082_v33  ;;  %v1879_v32 = vpack.c.bf16 %v1182_v24, %v1181_v23  ;;  %v1075_v33 = vld [vmem:[%s3013_s3 + $0x578] sm:$0xff]  ;;  %v1165_v34 = vld [vmem:[%s3013_s3 + $0x600] sm:$0xff]  ;;  %v1183_v39 = vld [vmem:[%s3013_s3 + $0x690] sm:$0xff] }
 0x20f   :  { %v1184_v46 = vld [vmem:[%s3013_s3 + $0x698] sm:$0xff]  ;;  %v501_v45 = vmax.f32 %v471_v30, 0.0  ;;  %v1173_v23 = vld [vmem:[%s3013_s3 + $0x640] sm:$0xff]  ;;  %v1174_v24 = vld [vmem:[%s3013_s3 + $0x648] sm:$0xff] }
 0x210   :  { %842 = vmatmul.mubr.f32.vlgmr.msra.gmra.mrb[2].mxu1 %v497_v54  ;;  %v1863_v54 = vpack.c.bf16 %v1085_v47, %v1084_v10  ;;  %v1883_v5 = vpack.c.bf16 %v1184_v46, %v1183_v39  ;;  %v1168_v10 = vld [vmem:[%s3013_s3 + $0x618] sm:$0xff]  ;;  %v1270_v47 = vld [vmem:[%s3013_s3 + $0x700] sm:$0xff]  ;;  %v1175_v46 = vld [vmem:[%s3013_s3 + $0x650] sm:$0xff] }
 0x211   :  { %1814 = vmatpush3.bf16.msra.mxu0 %v1813_v50  ;;  %1818 = vmatpush3.bf16.msra.mxu1 %v1817_v51  ;;  %v965_v50 = vld [vmem:[%s3013_s3 + $0x450] sm:$0xff]  ;;  %v966_v51 = vld [vmem:[%s3013_s3 + $0x458] sm:$0xff] }
 0x212   :  { %1051 = vmatprep.mubr.f32.mxu1 %v502_v62  ;;  %1820 = vmatprep.subr.bf16.mxu1 %v1819_v55  ;;  %v1069_v55 = vld [vmem:[%s3013_s3 + $0x548] sm:$0xff]  ;;  %v1837_v22 = vpack.c.bf16 %v966_v51, %v965_v50  ;;  %v967_v62 = vld [vmem:[%s3013_s3 + $0x460] sm:$0xff]  ;;  %v1277_v30 = vld [vmem:[%s3013_s3 + $0x738] sm:$0xff] }
 0x213   :  { %1848 = vmatprep.subr.bf16.mxu0 %v1847_v61  ;;  %v1087_v61 = vld [vmem:[%s3013_s3 + $0x5d8] sm:$0xff]  ;;  %v1865_v27 = vpack.c.bf16 %v1069_v55, %v1068_v44  ;;  %v1841_v12 = vpack.c.bf16 %v968_v63, %v967_v62  ;;  %v1885_v55 = vpack.c.bf16 %v1168_v10, %v1167_v43  ;;  %v1187_v62 = vld [vmem:[%s3013_s3 + $0x6b0] sm:$0xff]  ;;  %v1193_v43 = vld [vmem:[%s3013_s3 + $0x6e0] sm:$0xff] }
 0x214   :  { %947 = vmatmul.mubr.f32.vlgmr.msra.gmra.mrb[18].mxu0 %v499_v8  ;;  %v1867_v2 = vpack.c.bf16 %v1087_v61, %v1086_v59  ;;  %v1088_v8 = vld [vmem:[%s3013_s3 + $0x5e0] sm:$0xff]  ;;  %v1289_v44 = vld [vmem:[%s3013_s3 + $0x798] sm:$0xff] }
 0x215   :  { %1822 = vmatpush3.bf16.msra.mxu1 %v1821_v3  ;;  %1850 = vmatpush3.bf16.msra.mxu0 %v1849_v6  ;;  %v1070_v3 = vld [vmem:[%s3013_s3 + $0x550] sm:$0xff]  ;;  %v1071_v6 = vld [vmem:[%s3013_s3 + $0x558] sm:$0xff] }
 0x216   :  { %1156 = vmatprep.mubr.f32.mxu0 %v504_v19  ;;  %1824 = vmatprep.subr.bf16.mxu1 %v1823_v9  ;;  %v1089_v9 = vld [vmem:[%s3013_s3 + $0x5e8] sm:$0xff]  ;;  %v1869_v13 = vpack.c.bf16 %v1071_v6, %v1070_v3 }
 0x217   :  { %1852 = vmatprep.subr.bf16.mxu0 %v1851_v15  ;;  %v970_v15 = vld [vmem:[%s3013_s3 + $0x478] sm:$0xff]  ;;  %v1871_v17 = vpack.c.bf16 %v1089_v9, %v1088_v8  ;;  %v1073_v19 = vld [vmem:[%s3013_s3 + $0x568] sm:$0xff]  ;;  %v1171_v8 = vld [vmem:[%s3013_s3 + $0x630] sm:$0xff] }
 0x218   :  { %v1291_v3 = vld [vmem:[%s3013_s3 + $0x7a8] sm:$0xff]  ;;  %v1172_v9 = vld [vmem:[%s3013_s3 + $0x638] sm:$0xff] }
 0x219   :  { %1826 = vmatpush3.bf16.msra.mxu1 %v1825_v21  ;;  %1854 = vmatpush3.bf16.msra.mxu0 %v1853_v1  ;;  %v1090_v21 = vld [vmem:[%s3013_s3 + $0x5f0] sm:$0xff]  ;;  %v1091_v1 = vld [vmem:[%s3013_s3 + $0x5f8] sm:$0xff] }
 0x21a   :  { %1828 = vmatprep.subr.bf16.mxu1 %v1827_v26  ;;  %1856 = vmatprep.subr.bf16.mxu0 %v1855_v28  ;;  %v1845_v26 = vpack.c.bf16 %v970_v15, %v969_v14  ;;  %v1873_v28 = vpack.c.bf16 %v1073_v19, %v1072_v18  ;;  %v1875_v31 = vpack.c.bf16 %v1091_v1, %v1090_v21  ;;  %v1274_v14 = vld [vmem:[%s3013_s3 + $0x720] sm:$0xff]  ;;  %v1275_v15 = vld [vmem:[%s3013_s3 + $0x728] sm:$0xff]  ;;  %v1292_v18 = vld [vmem:[%s3013_s3 + $0x7b0] sm:$0xff] }
 0x21b   :  { %v1293_v19 = vld [vmem:[%s3013_s3 + $0x7b8] sm:$0xff]  ;;  %v1893_v21 = vpack.c.bf16 %v1172_v9, %v1171_v8  ;;  %v1921_v1 = vpack.c.bf16 %v1275_v15, %v1274_v14  ;;  %v1284_v8 = vld [vmem:[%s3013_s3 + $0x770] sm:$0xff] }
 0x21c   :  { %v1285_v9 = vld [vmem:[%s3013_s3 + $0x778] sm:$0xff] }
 0x21d   :  { %1830 = vmatpush3.bf16.msra.mxu1 %v1829_v35  ;;  %1858 = vmatpush3.bf16.msra.mxu0 %v1857_v36  ;;  %v1166_v35 = vld [vmem:[%s3013_s3 + $0x608] sm:$0xff]  ;;  %v2811_v36 = vpop.permute.xlu1 %347 }
 0x21e   :  { %1832 = vmatprep.subr.bf16.mxu1 %v1831_v40  ;;  %1860 = vmatprep.subr.bf16.mxu0 %v1859_v41  ;;  %v485_v37 = vadd.f32 %v2545_v11, %v2811_v36  ;;  %v1287_v40 = vld [vmem:[%s3013_s3 + $0x788] sm:$0xff]  ;;  %v1877_v41 = vpack.c.bf16 %v1075_v33, %v1074_v29  ;;  %v1881_v42 = vpack.c.bf16 %v1166_v35, %v1165_v34  ;;  %v1276_v29 = vld [vmem:[%s3013_s3 + $0x730] sm:$0xff]  ;;  %v1294_v33 = vld [vmem:[%s3013_s3 + $0x7c0] sm:$0xff] }
 0x21f   :  { %v477_v11 = vadd.f32 %v2509_v53, %v2637_v60  ;;  %v1911_v50 = vpack.c.bf16 %v1287_v40, %v1286_v38  ;;  %v1185_v53 = vld [vmem:[%s3013_s3 + $0x6a0] sm:$0xff]  ;;  %v1186_v60 = vld [vmem:[%s3013_s3 + $0x6a8] sm:$0xff]  ;;  %v1897_v35 = vpack.c.bf16 %v1174_v24, %v1173_v23  ;;  %v1925_v39 = vpack.c.bf16 %v1277_v30, %v1276_v29 }
 0x220   :  { %v506_v51 = vmax.f32 %v485_v37, 0.0  ;;  %v1887_v61 = vpack.c.bf16 %v1186_v60, %v1185_v53  ;;  %v1295_v34 = vld [vmem:[%s3013_s3 + $0x7c8] sm:$0xff]  ;;  %v1176_v37 = vld [vmem:[%s3013_s3 + $0x658] sm:$0xff] }
 0x221   :  { %1834 = vmatpush3.bf16.msra.mxu1 %v1833_v48  ;;  %1862 = vmatpush3.bf16.msra.mxu0 %v1861_v49  ;;  %v1271_v48 = vld [vmem:[%s3013_s3 + $0x708] sm:$0xff]  ;;  %v2841_v49 = vpop.permute.xlu0 %352  ;;  %v503_v59 = vmax.f32 %v477_v11, 0.0  ;;  %v1927_v40 = vpack.c.bf16 %v1295_v34, %v1294_v33  ;;  %v1296_v11 = vld [vmem:[%s3013_s3 + $0x7d0] sm:$0xff]  ;;  %v1901_v10 = vpack.c.bf16 %v1176_v37, %v1175_v46 }
 0x222   :  { %1836 = vmatprep.subr.bf16.mxu1 %v1835_v52  ;;  %1864 = vmatprep.subr.bf16.mxu0 %v1863_v54  ;;  %v491_v52 = vadd.f32 %v2573_v25, %v2841_v49  ;;  %v1288_v54 = vld [vmem:[%s3013_s3 + $0x790] sm:$0xff]  ;;  %v1913_v56 = vpack.c.bf16 %v1271_v48, %v1270_v47  ;;  %v1170_v25 = vld [vmem:[%s3013_s3 + $0x628] sm:$0xff]  ;;  %v1177_v48 = vld [vmem:[%s3013_s3 + $0x660] sm:$0xff]  ;;  %v489_v14 = vadd.f32 %v2565_v20, %v2841_v49 }
 0x223   :  { %v1915_v63 = vpack.c.bf16 %v1289_v44, %v1288_v54  ;;  %v1889_v7 = vpack.c.bf16 %v1170_v25, %v1169_v57  ;;  %v1195_v54 = vld [vmem:[%s3013_s3 + $0x6f0] sm:$0xff]  ;;  %v1196_v44 = vld [vmem:[%s3013_s3 + $0x6f8] sm:$0xff] }
 0x224   :  { %v508_v6 = vmax.f32 %v491_v52, 0.0  ;;  %v1281_v52 = vld [vmem:[%s3013_s3 + $0x758] sm:$0xff] }
 0x225   :  { %1838 = vmatpush3.bf16.msra.mxu1 %v1837_v22  ;;  %1866 = vmatpush3.bf16.msra.mxu0 %v1865_v27  ;;  %v1272_v22 = vld [vmem:[%s3013_s3 + $0x710] sm:$0xff]  ;;  %v1273_v27 = vld [vmem:[%s3013_s3 + $0x718] sm:$0xff] }
 0x226   :  { %1840 = vmatprep.subr.bf16.mxu1 %v1839_v0  ;;  %1868 = vmatprep.subr.bf16.mxu0 %v1867_v2  ;;  %v1188_v0 = vld [vmem:[%s3013_s3 + $0x6b8] sm:$0xff]  ;;  %v1290_v2 = vld [vmem:[%s3013_s3 + $0x7a0] sm:$0xff]  ;;  %v1917_v58 = vpack.c.bf16 %v1273_v27, %v1272_v22 }
 0x227   :  { %v1180_v27 = vld [vmem:[%s3013_s3 + $0x678] sm:$0xff] }
 0x229   :  { %1842 = vmatpush3.bf16.msra.mxu1 %v1841_v12  ;;  %1870 = vmatpush3.bf16.msra.mxu0 %v1869_v13  ;;  %v1891_v12 = vpack.c.bf16 %v1188_v0, %v1187_v62  ;;  %v1919_v13 = vpack.c.bf16 %v1291_v3, %v1290_v2  ;;  %v1282_v62 = vld [vmem:[%s3013_s3 + $0x760] sm:$0xff]  ;;  %v1300_v0 = vld [vmem:[%s3013_s3 + $0x7f0] sm:$0xff]  ;;  %v1301_v2 = vld [vmem:[%s3013_s3 + $0x7f8] sm:$0xff] }
 0x22a   :  { %1844 = vmatprep.subr.bf16.mxu1 %v1843_v16  ;;  %1872 = vmatprep.subr.bf16.mxu0 %v1871_v17  ;;  %v1189_v16 = vld [vmem:[%s3013_s3 + $0x6c0] sm:$0xff]  ;;  %v1190_v17 = vld [vmem:[%s3013_s3 + $0x6c8] sm:$0xff] }
 0x22d   :  { %1846 = vmatpush3.bf16.msra.mxu1 %v1845_v26  ;;  %1874 = vmatpush3.bf16.msra.mxu0 %v1873_v28  ;;  %v1895_v26 = vpack.c.bf16 %v1190_v17, %v1189_v16  ;;  %v1923_v28 = vpack.c.bf16 %v1293_v19, %v1292_v18  ;;  %v1390_v17 = vld [vmem:[%s3015_s4] ss:$0 sm:$0xff] }
 0x22e   :  { %1876 = vmatprep.subr.bf16.mxu0 %v1875_v31  ;;  %1880 = vmatprep.subr.bf16.mxu1 %v1879_v32  ;;  %v1191_v31 = vld [vmem:[%s3013_s3 + $0x6d0] sm:$0xff]  ;;  %v1192_v32 = vld [vmem:[%s3013_s3 + $0x6d8] sm:$0xff] }
 0x22f   :  { %v1899_v38 = vpack.c.bf16 %v1192_v32, %v1191_v31 }
 0x230   :  { %1052 = vmatmul.mubr.f32.vlgmr.msra.gmra.mrb[4].mxu1 %v501_v45  ;;  %v1194_v45 = vld [vmem:[%s3013_s3 + $0x6e8] sm:$0xff] }
 0x231   :  { %1878 = vmatpush3.bf16.msra.mxu0 %v1877_v41  ;;  %1882 = vmatpush3.bf16.msra.mxu1 %v1881_v42  ;;  %v1278_v41 = vld [vmem:[%s3013_s3 + $0x740] sm:$0xff]  ;;  %v1279_v42 = vld [vmem:[%s3013_s3 + $0x748] sm:$0xff]  ;;  %v1903_v53 = vpack.c.bf16 %v1194_v45, %v1193_v43 }
 0x232   :  { %1261 = vmatprep.mubr.f32.mxu1 %v506_v51  ;;  %1884 = vmatprep.subr.bf16.mxu1 %v1883_v5  ;;  %v1297_v5 = vld [vmem:[%s3013_s3 + $0x7d8] sm:$0xff]  ;;  %v1929_v47 = vpack.c.bf16 %v1279_v42, %v1278_v41  ;;  %v1280_v51 = vld [vmem:[%s3013_s3 + $0x750] sm:$0xff] }
 0x233   :  { %1912 = vmatprep.subr.bf16.mxu0 %v1911_v50  ;;  %v1178_v50 = vld [vmem:[%s3013_s3 + $0x668] sm:$0xff]  ;;  %v1931_v60 = vpack.c.bf16 %v1297_v5, %v1296_v11  ;;  %v1933_v25 = vpack.c.bf16 %v1281_v52, %v1280_v51 }
 0x234   :  { %1157 = vmatmul.mubr.f32.vlgmr.msra.gmra.mrb[20].mxu0 %v503_v59  ;;  %v1905_v57 = vpack.c.bf16 %v1178_v50, %v1177_v48  ;;  %v1179_v59 = vld [vmem:[%s3013_s3 + $0x670] sm:$0xff] }
 0x235   :  { %1886 = vmatpush3.bf16.msra.mxu1 %v1885_v55  ;;  %1914 = vmatpush3.bf16.msra.mxu0 %v1913_v56  ;;  %v1298_v55 = vld [vmem:[%s3013_s3 + $0x7e0] sm:$0xff]  ;;  %v1299_v56 = vld [vmem:[%s3013_s3 + $0x7e8] sm:$0xff]  ;;  %v1909_v3 = vpack.c.bf16 %v1180_v27, %v1179_v59 }
 0x236   :  { %1366 = vmatprep.mubr.f32.mxu0 %v508_v6  ;;  %1888 = vmatprep.subr.bf16.mxu1 %v1887_v61  ;;  %v1907_v61 = vpack.c.bf16 %v1196_v44, %v1195_v54  ;;  %v1935_v22 = vpack.c.bf16 %v1299_v56, %v1298_v55 }
 0x237   :  { %1916 = vmatprep.subr.bf16.mxu0 %v1915_v63  ;;  %v1283_v63 = vld [vmem:[%s3013_s3 + $0x768] sm:$0xff] }
 0x238   :  { %v1937_v6 = vpack.c.bf16 %v1283_v63, %v1282_v62 }
 0x239   :  { %1890 = vmatpush3.bf16.msra.mxu1 %v1889_v7  ;;  %1918 = vmatpush3.bf16.msra.mxu0 %v1917_v58  ;;  %v483_v7 = vadd.f32 %v2537_v4, %v2811_v36  ;;  %v1939_v58 = vpack.c.bf16 %v1301_v2, %v1300_v0  ;;  %v507_v4 = vmax.f32 %v489_v14, 0.0 }
 0x23a   :  { %1892 = vmatprep.subr.bf16.mxu1 %v1891_v12  ;;  %1920 = vmatprep.subr.bf16.mxu0 %v1919_v13  ;;  %v1941_v12 = vpack.c.bf16 %v1285_v9, %v1284_v8 }
 0x23b   :  { %v505_v13 = vmax.f32 %v483_v7, 0.0 }
 0x23d   :  { %1894 = vmatpush3.bf16.msra.mxu1 %v1893_v21  ;;  %1922 = vmatpush3.bf16.msra.mxu0 %v1921_v1 }
 0x23e   :  { %1896 = vmatprep.subr.bf16.mxu1 %v1895_v26  ;;  %1924 = vmatprep.subr.bf16.mxu0 %v1923_v28 }
 0x241   :  { %1898 = vmatpush3.bf16.msra.mxu1 %v1897_v35  ;;  %1926 = vmatpush3.bf16.msra.mxu0 %v1925_v39 }
 0x242   :  { %1900 = vmatprep.subr.bf16.mxu1 %v1899_v38  ;;  %1928 = vmatprep.subr.bf16.mxu0 %v1927_v40 }
 0x245   :  { %1902 = vmatpush3.bf16.msra.mxu1 %v1901_v10  ;;  %1930 = vmatpush3.bf16.msra.mxu0 %v1929_v47 }
 0x246   :  { %1904 = vmatprep.subr.bf16.mxu1 %v1903_v53  ;;  %1932 = vmatprep.subr.bf16.mxu0 %v1931_v60 }
 0x249   :  { %1906 = vmatpush3.bf16.msra.mxu1 %v1905_v57  ;;  %1934 = vmatpush3.bf16.msra.mxu0 %v1933_v25 }
 0x24a   :  { %1908 = vmatprep.subr.bf16.mxu1 %v1907_v61  ;;  %1936 = vmatprep.subr.bf16.mxu0 %v1935_v22 }
 0x24d   :  { %1910 = vmatpush3.bf16.msra.mxu1 %v1909_v3  ;;  %1938 = vmatpush3.bf16.msra.mxu0 %v1937_v6 }
 0x24e   :  { %1940 = vmatprep.subr.bf16.mxu0 %v1939_v58 }
 0x250   :  { %1262 = vmatmul.mubr.f32.vlgmr.msra.gmra.mrb[6].mxu1 %v505_v13 }
 0x251   :  { %1942 = vmatpush3.bf16.msra.mxu0 %v1941_v12 }
 0x254   :  { %1367 = vmatmul.mubr.f32.vlgmr.msra.gmra.mrb[22].mxu0 %v507_v4 }
 0x2c3   :  { %v1423_v36 = vpop.f32.mrb[0].mxu1 }
 0x2c4   :  { %v1424_v15 = vpop.f32.mrb[1].mxu1 }
 0x2c5   :  { %v1425_v16 = vadd.f32 %v1424_v15, %v1423_v36 }
 0x2c7   :  { %v1458_v18 = vpop.f32.mrb[16].mxu0  ;;  %v637_v21 = vadd.f32 %v1425_v16, %v1390_v17 }
 0x2c8   :  { %v1459_v19 = vpop.f32.mrb[17].mxu0 }
 0x2c9   :  { %v1460_v1 = vadd.f32 %v1459_v19, %v1458_v18 }
 0x2cb   :  { %v742_v23 = vadd.f32 %v1460_v1, %v637_v21 }
 0x2e3   :  { %v1493_v24 = vpop.f32.mrb[2].mxu1 }
 0x2e4   :  { %v1494_v26 = vpop.f32.mrb[3].mxu1 }
 0x2e5   :  { %v1495_v20 = vadd.f32 %v1494_v26, %v1493_v24 }
 0x2e7   :  { %v847_v49 = vadd.f32 %v1495_v20, %v742_v23  ;;  %v1528_v28 = vpop.f32.mrb[18].mxu0 }
 0x2e8   :  { %v1529_v29 = vpop.f32.mrb[19].mxu0 }
 0x2e9   :  { %v1530_v30 = vadd.f32 %v1529_v29, %v1528_v28 }
 0x2eb   :  { %v952_v31 = vadd.f32 %v1530_v30, %v847_v49 }
 0x303   :  { %v1563_v32 = vpop.f32.mrb[4].mxu1 }
 0x304   :  { %v1564_v33 = vpop.f32.mrb[5].mxu1 }
 0x305   :  { %v1565_v34 = vadd.f32 %v1564_v33, %v1563_v32 }
 0x307   :  { %v1057_v35 = vadd.f32 %v1565_v34, %v952_v31  ;;  %v1598_v39 = vpop.f32.mrb[20].mxu0 }
 0x308   :  { %v1599_v46 = vpop.f32.mrb[21].mxu0 }
 0x309   :  { %v1600_v37 = vadd.f32 %v1599_v46, %v1598_v39 }
 0x30b   :  { %v1162_v38 = vadd.f32 %v1600_v37, %v1057_v35 }
 0x323   :  { %v1633_v40 = vpop.f32.mrb[6].mxu1 }
 0x324   :  { %v1634_v41 = vpop.f32.mrb[7].mxu1 }
 0x325   :  { %v1635_v42 = vadd.f32 %v1634_v41, %v1633_v40 }
 0x327   :  { %v1267_v43 = vadd.f32 %v1635_v42, %v1162_v38  ;;  %v1668_v45 = vpop.f32.mrb[22].mxu0 }
 0x328   :  { %v1669_v11 = vpop.f32.mrb[23].mxu0 }
 0x329   :  { %v1670_v5 = vadd.f32 %v1669_v11, %v1668_v45 }
 0x32b   :  { %v1372_v10 = vadd.f32 %v1670_v5, %v1267_v43 }
 0x32d   :  { %1373 = vst [vmem:[%s3016_s5] sm:$0xff] %v1372_v10 }

</bundles_post_ra>
